<compile_context>
chip_gen: v6e
topology: v6e:2x2x1
jax: 0.10.0
libtpu: 0.0.40
codegen_flags: <defaults>
</compile_context>

<pallas_src>
import functools

import jax
import jax.numpy as jnp
from jax import lax
from jax.experimental import pallas as pl
from jax.experimental.pallas import tpu as pltpu

EPSILON = 1e-10
FT = 10          # conv1 output channels
FS = 10          # conv2 output channels
KW = 17          # conv1 kernel width (1, 17), padding (0, 8)
PAD = KW // 2
POOL_K = 75      # AvgPool2d kernel (1, 75)
POOL_S = 15      # AvgPool2d stride (1, 15)
LANE = 128


# ---------------------------------------------------------------------------
# Fused forward kernel.  Everything is a 2-D slab in VMEM; no in-kernel loops,
# reshapes or transposes.  n1 = B*M*T, n2 = B*T (true BN element counts).
# ---------------------------------------------------------------------------
def _scorer_kernel(n1, n2, xcol_ref, w1_ref, gup_ref, w2t_ref, pool_ref,
                   rrep_ref, msel_ref, csel_ref, fcw_ref, pk_ref, o_ref):
    f32 = jnp.float32
    hi = lax.Precision.HIGHEST
    dn0 = (((0,), (0,)), ((), ()))      # contract leading dims: lhs^T @ rhs

    # packed per-channel params: columns = [g1 | g2 | bt2 | fcb]
    pk = pk_ref[...]
    g1 = pk[:FT, 0:1]
    g2 = pk[:FS, 1:2]
    bt2 = pk[:FS, 2:3]
    m_rows = o_ref.shape[0]
    fcb = pk[:m_rows, 3:4]

    # ---- conv1: one MXU matmul over the im2col'd input (bias cancelled by BN1) ----
    h1 = jnp.dot(w1_ref[...], xcol_ref[...],
                 preferred_element_type=f32)                     # (FT*M, BT_pad)

    # ---- BN1 stats (train mode, eps=0): exact f32 lane sums + tiny HIGHEST dots ----
    rs = jnp.sum(h1, axis=1, keepdims=True)                      # (FT*M, 1)
    rq = jnp.sum(h1 * h1, axis=1, keepdims=True)                 # (FT*M, 1)
    mean1 = lax.dot_general(gup_ref[...], rs, dn0, precision=hi,
                            preferred_element_type=f32) * (1.0 / n1)   # (FT, 1)
    ex2_1 = lax.dot_general(gup_ref[...], rq, dn0, precision=hi,
                            preferred_element_type=f32) * (1.0 / n1)   # (FT, 1)
    var1 = jnp.maximum(ex2_1 - mean1 * mean1, 0.0)
    scale1 = g1 * lax.rsqrt(var1)                                # eps = 0

    # ---- fold BN1 scale into conv2 weights (shift cancels through BN2's mean) ----
    scale1_r = jnp.dot(gup_ref[...], scale1,
                       preferred_element_type=f32)               # (FT*M, 1)
    w2s = w2t_ref[...] * scale1_r                                # (FT*M, FS), f32

    # ---- conv2: contract jointly over (f, m); lhs is stored transposed ----
    h2 = lax.dot_general(w2s, h1, dn0,
                         preferred_element_type=f32)             # (FS, BT_pad)

    # ---- BN2 (train, eps=0) + square; padded lanes of h2 are zero ----
    mean2 = jnp.sum(h2, axis=1, keepdims=True) * (1.0 / n2)      # (FS, 1)
    ex2_2 = jnp.sum(h2 * h2, axis=1, keepdims=True) * (1.0 / n2)
    var2 = jnp.maximum(ex2_2 - mean2 * mean2, 0.0)
    scale2 = g2 * lax.rsqrt(var2)
    shift2 = bt2 - mean2 * scale2
    h2n = h2 * scale2 + shift2
    h2sq = h2n * h2n                                             # (FS, BT_pad)

    # ---- avgpool(1,75)/15: one block-diagonal matmul (zero rows mask the padding) --
    pooledA = jnp.dot(h2sq, pool_ref[...],
                      preferred_element_type=f32)                # (FS, B*L)

    # ---- tiny (FS, B*L) -> (FS*L, B) re-layout as matmuls (rrep carries the 1/75) --
    g = jnp.dot(rrep_ref[...], pooledA, precision=hi,
                preferred_element_type=f32)                      # (FS*L, B*L)
    pooledR = jnp.dot(g * msel_ref[...], csel_ref[...], precision=hi,
                      preferred_element_type=f32)                # (FS*L, B)

    # ---- log(clamp) + fc1 ----
    feat = jnp.log(jnp.maximum(pooledR, EPSILON))                # (FS*L, B)
    o_ref[...] = jnp.dot(fcw_ref[...], feat, precision=hi,
                         preferred_element_type=f32) + fcb       # (M, B)


# ---------------------------------------------------------------------------
# One-time preparation of all x-independent constant operands (hoisted out of
# the per-call path, per the review).
# ---------------------------------------------------------------------------
def prepare(params, B, M, T):
    assert T >= POOL_K and (T - POOL_K) % POOL_S == 0
    L = 1 + (T - POOL_K) // POOL_S
    BT = B * T
    BT_pad = ((BT + LANE - 1) // LANE) * LANE
    f32, bf16 = jnp.float32, jnp.bfloat16

    # conv1 weight as a block matrix over (f,m) rows x (m,k) columns
    eye_m = jnp.eye(M, dtype=f32)
    w1big = jnp.einsum('fk,mn->fmnk', params["w1"], eye_m).reshape(FT * M, M * KW)
    w1big = w1big.astype(bf16)

    # BN1 group structure (row (f,m) -> channel f)
    gup = jnp.kron(jnp.eye(FT, dtype=f32), jnp.ones((M, 1), f32))     # (FT*M, FT)

    # conv2 weight, stored transposed so the BN1 scale fold is a sublane broadcast
    w2t = params["w2"].reshape(FS, FT * M).T.astype(f32)              # (FT*M, FS)

    # pooling matmul: block-diagonal 0/1 window matrix, zero rows for lane padding
    t_idx = jnp.arange(T)[:, None]
    l_idx = jnp.arange(L)[None, :]
    win = ((t_idx >= l_idx * POOL_S) &
           (t_idx < l_idx * POOL_S + POOL_K)).astype(f32)             # (T, L)
    poolmat = jnp.kron(jnp.eye(B, dtype=f32), win)                    # (B*T, B*L)
    poolmat = jnp.pad(poolmat, ((0, BT_pad - BT), (0, 0))).astype(bf16)

    # tiny (FS, B*L) -> (FS*L, B) re-layout operators (rrep carries the 1/POOL_K)
    rrep = jnp.kron(jnp.eye(FS, dtype=f32), jnp.ones((L, 1), f32)) / POOL_K  # (FS*L, FS)
    msel = jnp.tile(jnp.eye(L, dtype=f32), (FS, B))                   # (FS*L, B*L)
    csel = jnp.kron(jnp.eye(B, dtype=f32), jnp.ones((L, 1), f32))     # (B*L, B)

    fcw = params["fcw"].astype(f32)                                   # (M, FS*L)

    # packed tiny per-channel params: [g1 | g2 | bt2 | fcb], zero-padded rows
    P = max(FT, FS, M)
    def col(v):
        return jnp.pad(v.astype(f32), (0, P - v.shape[0]))[:, None]
    packed = jnp.concatenate(
        [col(params["g1"]), col(params["g2"]), col(params["bt2"]), col(params["fcb"])],
        axis=1)                                                       # (P, 4)

    return dict(w1big=w1big, gup=gup, w2t=w2t, poolmat=poolmat, rrep=rrep,
                msel=msel, csel=csel, fcw=fcw, packed=packed,
                B=B, M=M, T=T, L=L, BT=BT, BT_pad=BT_pad)


# ---------------------------------------------------------------------------
# Per-call wrapper: im2col + lane padding (pure data movement) and the kernel call.
# ---------------------------------------------------------------------------
def channel_scorer_forward(x, prep):
    """x: (B, 1, M, T) float32 NCHW, exactly like the PyTorch module."""
    B, C, M, T = x.shape
    assert C == 1 and B == prep["B"] and M == prep["M"] and T == prep["T"]
    BT, BT_pad = prep["BT"], prep["BT_pad"]

    # im2col of the padded input: xcol[(m*KW+k), (b*T+t)] = xpad[b, m, t+k]
    xpad = jnp.pad(x[:, 0], ((0, 0), (0, 0), (PAD, PAD)))                    # (B, M, T+2P)
    patches = jnp.stack([xpad[:, :, k:k + T] for k in range(KW)], axis=0)    # (KW, B, M, T)
    xcol = patches.transpose(2, 0, 1, 3).reshape(M * KW, BT)
    xcol = jnp.pad(xcol, ((0, 0), (0, BT_pad - BT))).astype(jnp.bfloat16)    # (M*KW, BT_pad)

    kernel = functools.partial(_scorer_kernel, float(B * M * T), float(BT))
    vmem = pl.BlockSpec(memory_space=pltpu.MemorySpace.VMEM)
    out_mb = pl.pallas_call(
        kernel,
        out_shape=jax.ShapeDtypeStruct((M, B), jnp.float32),
        in_specs=[vmem] * 10,
        out_specs=vmem,
        compiler_params=pltpu.CompilerParams(vmem_limit_bytes=32 * 1024 * 1024),
    )(xcol, prep["w1big"], prep["gup"], prep["w2t"], prep["poolmat"],
      prep["rrep"], prep["msel"], prep["csel"], prep["fcw"], prep["packed"])

    return out_mb.T.reshape(B, M, 1)                 # matches x.view(-1, M, 1)


# ---------------------------------------------------------------------------
# Deterministic synthetic parameters matching the PyTorch module shapes.
# b1 / b2 / bt1 are used ONLY by the reference: the kernel drops them because the
# train-mode BatchNorms cancel them exactly.
# ---------------------------------------------------------------------------
def init_params(key, M, T):
    assert T >= POOL_K and (T - POOL_K) % POOL_S == 0
    L = 1 + (T - POOL_K) // POOL_S
    ks = jax.random.split(key, 10)
    return dict(
        w1=jax.random.normal(ks[0], (FT, KW), jnp.float32) / jnp.sqrt(KW),
        b1=jax.random.normal(ks[1], (FT,), jnp.float32) * 0.1,
        g1=1.0 + 0.1 * jax.random.normal(ks[2], (FT,), jnp.float32),
        bt1=0.2 * jax.random.normal(ks[3], (FT,), jnp.float32),
        w2=jax.random.normal(ks[4], (FS, FT, M), jnp.float32) / jnp.sqrt(FT * M),
        b2=jax.random.normal(ks[5], (FS,), jnp.float32) * 0.1,
        g2=1.0 + 0.1 * jax.random.normal(ks[6], (FS,), jnp.float32),
        bt2=0.2 * jax.random.normal(ks[7], (FS,), jnp.float32),
        fcw=jax.random.normal(ks[8], (M, FS * L), jnp.float32) / jnp.sqrt(FS * L),
        fcb=jax.random.normal(ks[9], (M,), jnp.float32) * 0.1,
    )


# ---------------------------------------------------------------------------
# Pure-JAX f32 reference replicating the PyTorch forward (train-mode BN, eps=0),
# including the conv biases and BN1 beta that the kernel algebraically drops.
# ---------------------------------------------------------------------------
def reference(x, params):
    B, _, M, T = x.shape
    L = 1 + (T - POOL_K) // POOL_S
    xpad = jnp.pad(x[:, 0], ((0, 0), (0, 0), (PAD, PAD)))
    patches = jnp.stack([xpad[:, :, k:k + T] for k in range(KW)], axis=-1)   # (B,M,T,KW)
    h1 = jnp.einsum("bmtk,fk->bfmt", patches, params["w1"]) + params["b1"][None, :, None, None]
    m1 = h1.mean(axis=(0, 2, 3), keepdims=True)
    v1 = ((h1 - m1) ** 2).mean(axis=(0, 2, 3), keepdims=True)
    h1 = ((h1 - m1) / jnp.sqrt(v1)) * params["g1"][None, :, None, None] + params["bt1"][None, :, None, None]
    h2 = jnp.einsum("sfm,bfmt->bst", params["w2"], h1) + params["b2"][None, :, None]
    m2 = h2.mean(axis=(0, 2), keepdims=True)
    v2 = ((h2 - m2) ** 2).mean(axis=(0, 2), keepdims=True)
    h2 = ((h2 - m2) / jnp.sqrt(v2)) * params["g2"][None, :, None] + params["bt2"][None, :, None]
    h2 = h2 ** 2
    pooled = jnp.stack([h2[:, :, l * POOL_S: l * POOL_S + POOL_K].mean(axis=2)
                        for l in range(L)], axis=-1)                          # (B, FS, L)
    feat = jnp.log(jnp.maximum(pooled, EPSILON)).reshape(B, FS * L)
    out = feat @ params["fcw"].T + params["fcb"]
    return out.reshape(B, M, 1)


if __name__ == "__main__":
    B, M, T = 2, 4, 90          # M EEG channels, T time samples ((T-75) % 15 == 0)
    key = jax.random.PRNGKey(0)
    kx, kp = jax.random.split(key)
    x = jax.random.normal(kx, (B, 1, M, T), jnp.float32)
    params = init_params(kp, M, T)

    prep = prepare(params, B, M, T)
    out = channel_scorer_forward(x, prep)
    out = jax.block_until_ready(out)
    assert out.shape == (B, M, 1)

    ref = reference(x, params)
    err = float(jnp.max(jnp.abs(out - ref)))
    # Tolerance accounts for bf16-operand (default-precision) MXU matmuls on the
    # large slabs vs. the all-f32 elementwise reference path.
    if err > 2e-2:
        raise AssertionError(f"Pallas kernel mismatch vs reference, max abs err = {err}")

    print("KERNEL_OK")
</pallas_src>

<mosaic_0001>
module attributes {stable_mosaic.version = 11 : i64} {
  func.func @_scorer_kernel(%arg0: memref<68x256xbf16, #tpu.memory_space<vmem>>, %arg1: memref<40x68xbf16, #tpu.memory_space<vmem>>, %arg2: memref<40x10xf32, #tpu.memory_space<vmem>>, %arg3: memref<40x10xf32, #tpu.memory_space<vmem>>, %arg4: memref<256x4xbf16, #tpu.memory_space<vmem>>, %arg5: memref<20x10xf32, #tpu.memory_space<vmem>>, %arg6: memref<20x4xf32, #tpu.memory_space<vmem>>, %arg7: memref<4x2xf32, #tpu.memory_space<vmem>>, %arg8: memref<4x20xf32, #tpu.memory_space<vmem>>, %arg9: memref<10x4xf32, #tpu.memory_space<vmem>>, %arg10: memref<4x2xf32, #tpu.memory_space<vmem>>) attributes {dimension_semantics = [], scalar_prefetch = 0 : i64, scratch_operands = 0 : i64, tpu.core_type = #tpu.core_type<tc>} {
    %c0 = arith.constant 0 : index
    %c0_0 = arith.constant 0 : index
    %0 = vector.load %arg9[%c0, %c0_0] : memref<10x4xf32, #tpu.memory_space<vmem>>, vector<10x4xf32>
    %1 = vector.extract_strided_slice %0 {offsets = [0, 0], sizes = [10, 1], strides = [1, 1]} : vector<10x4xf32> to vector<10x1xf32>
    %2 = vector.extract_strided_slice %0 {offsets = [0, 1], sizes = [10, 1], strides = [1, 1]} : vector<10x4xf32> to vector<10x1xf32>
    %3 = vector.extract_strided_slice %0 {offsets = [0, 2], sizes = [10, 1], strides = [1, 1]} : vector<10x4xf32> to vector<10x1xf32>
    %4 = vector.extract_strided_slice %0 {offsets = [0, 3], sizes = [4, 1], strides = [1, 1]} : vector<10x4xf32> to vector<4x1xf32>
    %c0_1 = arith.constant 0 : index
    %c0_2 = arith.constant 0 : index
    %5 = vector.load %arg1[%c0_1, %c0_2] : memref<40x68xbf16, #tpu.memory_space<vmem>>, vector<40x68xbf16>
    %c0_3 = arith.constant 0 : index
    %c0_4 = arith.constant 0 : index
    %6 = vector.load %arg0[%c0_3, %c0_4] : memref<68x256xbf16, #tpu.memory_space<vmem>>, vector<68x256xbf16>
    %cst = arith.constant dense<0.000000e+00> : vector<40x256xf32>
    %7 = tpu.matmul %5, %6, %cst {dimension_numbers = #tpu.dot_dimension_numbers<[1], [0], [0], [1], [0, 0, 1, 1], [], []>} : vector<40x68xbf16>, vector<68x256xbf16>, vector<40x256xf32> -> vector<40x256xf32>
    %cst_5 = arith.constant dense<0.000000e+00> : vector<40xf32>
    %8 = vector.multi_reduction <add>, %7, %cst_5 [1] : vector<40x256xf32> to vector<40xf32>
    %9 = vector.shape_cast %8 : vector<40xf32> to vector<40x1xf32>
    %10 = arith.mulf %7, %7 : vector<40x256xf32>
    %cst_6 = arith.constant dense<0.000000e+00> : vector<40xf32>
    %11 = vector.multi_reduction <add>, %10, %cst_6 [1] : vector<40x256xf32> to vector<40xf32>
    %12 = vector.shape_cast %11 : vector<40xf32> to vector<40x1xf32>
    %c0_7 = arith.constant 0 : index
    %c0_8 = arith.constant 0 : index
    %13 = vector.load %arg2[%c0_7, %c0_8] : memref<40x10xf32, #tpu.memory_space<vmem>>, vector<40x10xf32>
    %cst_9 = arith.constant dense<0.000000e+00> : vector<10x1xf32>
    %14 = tpu.matmul %13, %9, %cst_9 {dimension_numbers = #tpu.dot_dimension_numbers<[0], [0], [1], [1], [0, 1, 1, 1], [], []>, precision = #tpu.contract_precision<fp32>} : vector<40x10xf32>, vector<40x1xf32>, vector<10x1xf32> -> vector<10x1xf32>
    %cst_10 = arith.constant 0.00138888892 : f32
    %15 = vector.broadcast %cst_10 : f32 to vector<10x1xf32>
    %16 = arith.mulf %14, %15 : vector<10x1xf32>
    %c0_11 = arith.constant 0 : index
    %c0_12 = arith.constant 0 : index
    %17 = vector.load %arg2[%c0_11, %c0_12] : memref<40x10xf32, #tpu.memory_space<vmem>>, vector<40x10xf32>
    %cst_13 = arith.constant dense<0.000000e+00> : vector<10x1xf32>
    %18 = tpu.matmul %17, %12, %cst_13 {dimension_numbers = #tpu.dot_dimension_numbers<[0], [0], [1], [1], [0, 1, 1, 1], [], []>, precision = #tpu.contract_precision<fp32>} : vector<40x10xf32>, vector<40x1xf32>, vector<10x1xf32> -> vector<10x1xf32>
    %cst_14 = arith.constant 0.00138888892 : f32
    %19 = vector.broadcast %cst_14 : f32 to vector<10x1xf32>
    %20 = arith.mulf %18, %19 : vector<10x1xf32>
    %21 = arith.mulf %16, %16 : vector<10x1xf32>
    %22 = arith.subf %20, %21 : vector<10x1xf32>
    %cst_15 = arith.constant 0.000000e+00 : f32
    %23 = vector.broadcast %cst_15 : f32 to vector<10x1xf32>
    %24 = arith.maximumf %22, %23 : vector<10x1xf32>
    %25 = math.rsqrt %24 : vector<10x1xf32>
    %26 = arith.mulf %1, %25 : vector<10x1xf32>
    %c0_16 = arith.constant 0 : index
    %c0_17 = arith.constant 0 : index
    %27 = vector.load %arg2[%c0_16, %c0_17] : memref<40x10xf32, #tpu.memory_space<vmem>>, vector<40x10xf32>
    %cst_18 = arith.constant dense<0.000000e+00> : vector<40x1xf32>
    %28 = tpu.matmul %27, %26, %cst_18 {dimension_numbers = #tpu.dot_dimension_numbers<[1], [0], [0], [1], [0, 0, 1, 1], [], []>} : vector<40x10xf32>, vector<10x1xf32>, vector<40x1xf32> -> vector<40x1xf32>
    %c0_19 = arith.constant 0 : index
    %c0_20 = arith.constant 0 : index
    %29 = vector.load %arg3[%c0_19, %c0_20] : memref<40x10xf32, #tpu.memory_space<vmem>>, vector<40x10xf32>
    %30 = vector.broadcast %28 : vector<40x1xf32> to vector<40x10xf32>
    %31 = arith.mulf %29, %30 : vector<40x10xf32>
    %cst_21 = arith.constant dense<0.000000e+00> : vector<10x256xf32>
    %32 = tpu.matmul %31, %7, %cst_21 {dimension_numbers = #tpu.dot_dimension_numbers<[0], [0], [1], [1], [0, 1, 1, 1], [], []>} : vector<40x10xf32>, vector<40x256xf32>, vector<10x256xf32> -> vector<10x256xf32>
    %cst_22 = arith.constant dense<0.000000e+00> : vector<10xf32>
    %33 = vector.multi_reduction <add>, %32, %cst_22 [1] : vector<10x256xf32> to vector<10xf32>
    %34 = vector.shape_cast %33 : vector<10xf32> to vector<10x1xf32>
    %cst_23 = arith.constant 0.00555555569 : f32
    %35 = vector.broadcast %cst_23 : f32 to vector<10x1xf32>
    %36 = arith.mulf %34, %35 : vector<10x1xf32>
    %37 = arith.mulf %32, %32 : vector<10x256xf32>
    %cst_24 = arith.constant dense<0.000000e+00> : vector<10xf32>
    %38 = vector.multi_reduction <add>, %37, %cst_24 [1] : vector<10x256xf32> to vector<10xf32>
    %39 = vector.shape_cast %38 : vector<10xf32> to vector<10x1xf32>
    %cst_25 = arith.constant 0.00555555569 : f32
    %40 = vector.broadcast %cst_25 : f32 to vector<10x1xf32>
    %41 = arith.mulf %39, %40 : vector<10x1xf32>
    %42 = arith.mulf %36, %36 : vector<10x1xf32>
    %43 = arith.subf %41, %42 : vector<10x1xf32>
    %cst_26 = arith.constant 0.000000e+00 : f32
    %44 = vector.broadcast %cst_26 : f32 to vector<10x1xf32>
    %45 = arith.maximumf %43, %44 : vector<10x1xf32>
    %46 = math.rsqrt %45 : vector<10x1xf32>
    %47 = arith.mulf %2, %46 : vector<10x1xf32>
    %48 = arith.mulf %36, %47 : vector<10x1xf32>
    %49 = arith.subf %3, %48 : vector<10x1xf32>
    %50 = vector.broadcast %47 : vector<10x1xf32> to vector<10x256xf32>
    %51 = arith.mulf %32, %50 : vector<10x256xf32>
    %52 = vector.broadcast %49 : vector<10x1xf32> to vector<10x256xf32>
    %53 = arith.addf %51, %52 : vector<10x256xf32>
    %54 = arith.mulf %53, %53 : vector<10x256xf32>
    %c0_27 = arith.constant 0 : index
    %c0_28 = arith.constant 0 : index
    %55 = vector.load %arg4[%c0_27, %c0_28] : memref<256x4xbf16, #tpu.memory_space<vmem>>, vector<256x4xbf16>
    %cst_29 = arith.constant dense<0.000000e+00> : vector<10x4xf32>
    %56 = tpu.matmul %54, %55, %cst_29 {dimension_numbers = #tpu.dot_dimension_numbers<[1], [0], [0], [1], [0, 0, 1, 1], [], []>} : vector<10x256xf32>, vector<256x4xbf16>, vector<10x4xf32> -> vector<10x4xf32>
    %c0_30 = arith.constant 0 : index
    %c0_31 = arith.constant 0 : index
    %57 = vector.load %arg5[%c0_30, %c0_31] : memref<20x10xf32, #tpu.memory_space<vmem>>, vector<20x10xf32>
    %cst_32 = arith.constant dense<0.000000e+00> : vector<20x4xf32>
    %58 = tpu.matmul %57, %56, %cst_32 {dimension_numbers = #tpu.dot_dimension_numbers<[1], [0], [0], [1], [0, 0, 1, 1], [], []>, precision = #tpu.contract_precision<fp32>} : vector<20x10xf32>, vector<10x4xf32>, vector<20x4xf32> -> vector<20x4xf32>
    %c0_33 = arith.constant 0 : index
    %c0_34 = arith.constant 0 : index
    %59 = vector.load %arg6[%c0_33, %c0_34] : memref<20x4xf32, #tpu.memory_space<vmem>>, vector<20x4xf32>
    %60 = arith.mulf %58, %59 : vector<20x4xf32>
    %c0_35 = arith.constant 0 : index
    %c0_36 = arith.constant 0 : index
    %61 = vector.load %arg7[%c0_35, %c0_36] : memref<4x2xf32, #tpu.memory_space<vmem>>, vector<4x2xf32>
    %cst_37 = arith.constant dense<0.000000e+00> : vector<20x2xf32>
    %62 = tpu.matmul %60, %61, %cst_37 {dimension_numbers = #tpu.dot_dimension_numbers<[1], [0], [0], [1], [0, 0, 1, 1], [], []>, precision = #tpu.contract_precision<fp32>} : vector<20x4xf32>, vector<4x2xf32>, vector<20x2xf32> -> vector<20x2xf32>
    %cst_38 = arith.constant 1.000000e-10 : f32
    %63 = vector.broadcast %cst_38 : f32 to vector<20x2xf32>
    %64 = arith.maximumf %62, %63 : vector<20x2xf32>
    %65 = math.log %64 : vector<20x2xf32>
    %c0_39 = arith.constant 0 : index
    %c0_40 = arith.constant 0 : index
    %66 = vector.load %arg8[%c0_39, %c0_40] : memref<4x20xf32, #tpu.memory_space<vmem>>, vector<4x20xf32>
    %cst_41 = arith.constant dense<0.000000e+00> : vector<4x2xf32>
    %67 = tpu.matmul %66, %65, %cst_41 {dimension_numbers = #tpu.dot_dimension_numbers<[1], [0], [0], [1], [0, 0, 1, 1], [], []>, precision = #tpu.contract_precision<fp32>} : vector<4x20xf32>, vector<20x2xf32>, vector<4x2xf32> -> vector<4x2xf32>
    %68 = vector.broadcast %4 : vector<4x1xf32> to vector<4x2xf32>
    %69 = arith.addf %67, %68 : vector<4x2xf32>
    %c0_42 = arith.constant 0 : index
    %c0_43 = arith.constant 0 : index
    %70 = vector.load %arg10[%c0_42, %c0_43] : memref<4x2xf32, #tpu.memory_space<vmem>>, vector<4x2xf32>
    tpu.vector_store %arg10[%c0_42, %c0_43], %69 {strides = array<i32>} : memref<4x2xf32, #tpu.memory_space<vmem>>, vector<4x2xf32>,
    return
  }
}

</mosaic_0001>

<bundles_post_ra>
// kernel: tpu_custom_call.1
= control target key start
LH: loop header
LB: loop body
LE: loop exit
PB: predicated region body
PF: predicated region fallthrough
CT: control target
= control target key end

     0   :  { %vm120_vm0 = vcmask 1041408   ;;  %v4156_v1 = vmov 0   ;;  %vm110_vm1 = vcmask 556032   ;;  %vm265_vm2 = vcmask 326656   ;;  %s4927_s0 = inlined_call_operand.vmem [shape: bf16[68,256], index: 0, kind: input, shape index: {}]   ;;  %s4928_s1 = inlined_call_operand.vmem [shape: bf16[40,68], index: 1, kind: input, shape index: {}]   ;;  %s4929_s2 = inlined_call_operand.vmem [shape: f32[40,10], index: 2, kind: input, shape index: {}]   ;;  %s4930_s9 = inlined_call_operand.vmem [shape: f32[10,4], index: 9, kind: input, shape index: {}]   ;;  %s4931_s3 = inlined_call_operand.vmem [shape: f32[40,10], index: 3, kind: input, shape index: {}]   ;;  %s4932_s4 = inlined_call_operand.vmem [shape: bf16[256,4], index: 4, kind: input, shape index: {}]   ;;  %s4933_s5 = inlined_call_operand.vmem [shape: f32[20,10], index: 5, kind: input, shape index: {}]   ;;  %s4934_s7 = inlined_call_operand.vmem [shape: f32[4,2], index: 7, kind: input, shape index: {}]   ;;  %s4935_s6 = inlined_call_operand.vmem [shape: f32[20,4], index: 6, kind: input, shape index: {}]   ;;  %s4936_s8 = inlined_call_operand.vmem [shape: f32[4,20], index: 8, kind: input, shape index: {}]   ;;  %s4937_s10 = inlined_call_operand.vmem [shape: f32[4,2], index: 10, kind: output, shape index: {}]  }
   0x1   :  { %v51_v0 = vld [vmem:[%s4927_s0 + $0x40] sm:$0x33]  ;;  %159 = vmatprep.mubr.bf16.mxu0 %v4156_v1  ;;  %4101 = vset.pattern.permute.xlu0 %v4156_v1  ;;  %v4111_v4 = vld [vmem:[%s4927_s0 + $0x34] ss:$8 sps:$4 sm:$0xff]   ;;  %v4113_v6 = vld [vmem:[%s4927_s0 + $0x30] ss:$8 sps:$4 sm:$0xff]  }
   0x2   :  { %v3501_v2 = vcombine.high %v51_v0, %v51_v0  ;;  %v3500_v3 = vcombine.low %v51_v0, %v51_v0  ;;  %v4114_v7 = vld [vmem:[%s4927_s0 + $0x24] ss:$8 sps:$4 sm:$0xff]   ;;  %v4116_v8 = vld [vmem:[%s4927_s0 + $0x20] ss:$8 sps:$4 sm:$0xff]   ;;  %v4117_v9 = vld [vmem:[%s4927_s0 + $0x14] ss:$8 sps:$4 sm:$0xff]  }
   0x3   :  { %v4119_v10 = vld [vmem:[%s4927_s0 + $0x10] ss:$8 sps:$4 sm:$0xff]   ;;  %v4120_v11 = vld [vmem:[%s4927_s0 + $0x4] ss:$8 sps:$4 sm:$0xff]   ;;  %v4122_v12 = vld [vmem:[%s4927_s0] ss:$8 sps:$4 sm:$0xff]  }
   0x4   :  { %3502 = vmatprep.subr.msk.bf16.mxu0 %vm120_vm0, %v3501_v2  ;;  %v122_v5 = vsel %vm120_vm0, %v3500_v3, 0  ;;  %v4123_v13 = vld [vmem:[%s4928_s1] sm:$0xff]   ;;  %v4124_v14 = vld [vmem:[%s4928_s1 + $0x8] sm:$0xff]   ;;  %v4125_v15 = vld [vmem:[%s4928_s1 + $0x10] ss:$0 sps:$4 sm:$0xff]   ;;  %vm4158_vm3 = vmmov 0  }
   0x5   :  { %134 = vmatpush1.bf16.msra.mxu0 %v122_v5  ;;  %v4313_v48 = vld [vmem:[%s4929_s2] sm:$0xff]  ;;  %v4319_v49 = vld [vmem:[%s4929_s2 + $0x8] sm:$0xff]  ;;  %v4325_v50 = vld [vmem:[%s4929_s2 + $0x10] sm:$0xff]  ;;  %vm1368_vm4 = vcmask 80896   ;;  %vm2453_vm5 = vcmask 1043456   ;;  %vm2443_vm6 = vcmask 31744  }
   0x6   :  { %135 = vmatprep.subr.bf16.mxu0 %v4111_v4  ;;  %v4331_v51 = vld [vmem:[%s4929_s2 + $0x18] sm:$0xff]  ;;  %v4337_v52 = vld [vmem:[%s4929_s2 + $0x20] sm:$0xff]  ;;  %vm3004_vm7 = vcmask 162816   ;;  %vm3483_vm8 = vcmask 11264  }
   0x9   :  { %136 = vmatpush1.bf16.msra.mxu0 %v4113_v6 }
   0xa   :  { %137 = vmatprep.subr.bf16.mxu0 %v4114_v7 }
   0xd   :  { %138 = vmatpush1.bf16.msra.mxu0 %v4116_v8 }
   0xe   :  { %139 = vmatprep.subr.bf16.mxu0 %v4117_v9 }
  0x11   :  { %140 = vmatpush1.bf16.msra.mxu0 %v4119_v10 }
  0x12   :  { %141 = vmatprep.subr.bf16.mxu0 %v4120_v11 }
  0x15   :  { %142 = vmatpush1.bf16.msra.mxu0 %v4122_v12 }
  0x18   :  { %3503 = vmatmul.mubr.msk.bf16.vlgmr.msra.gmra.mxu0 %vm110_vm1, %v4123_v13 }
  0x19   :  { %169 = vmatprep.mubr.bf16.mxu0 %v4156_v1 }
  0x20   :  { %3504 = vmatmul.mubr.msk.bf16.gmra.mxu0 %vm110_vm1, %v4124_v14 }
  0x21   :  { %179 = vmatprep.mubr.bf16.mxu0 %v4156_v1 }
  0x28   :  { %3505 = vmatmul.mubr.msk.bf16.gmra.mxu0 %vm110_vm1, %v4125_v15 }
  0xd8   :  { %v4260_v16 = vpop.f32.mrf.mxu0 }
  0xd9   :  { %v203_v46 = vmul.f32 %v4260_v16, %v4260_v16 }
  0xda   :  { %v4262_v17 = vpop.f32.mrf.mxu0 }
  0xdb   :  { %v188_v32 = vadd.f32 %v4262_v17, %v4260_v16  ;;  %v204_v45 = vmul.f32 %v4262_v17, %v4262_v17 }
  0xdc   :  { %v4264_v18 = vpop.f32.mrf.mxu0 }
  0xdd   :  { %v205_v43 = vmul.f32 %v4264_v18, %v4264_v18  ;;  %v213_v47 = vadd.f32 %v204_v45, %v203_v46 }
  0xde   :  { %v4266_v19 = vpop.f32.mrf.mxu0 }
  0xdf   :  { %v191_v25 = vadd.f32 %v4266_v19, %v4264_v18  ;;  %v206_v42 = vmul.f32 %v4266_v19, %v4266_v19 }
  0xe0   :  { %v4268_v20 = vpop.f32.mrf.mxu0 }
  0xe1   :  { %v207_v37 = vmul.f32 %v4268_v20, %v4268_v20  ;;  %v216_v44 = vadd.f32 %v206_v42, %v205_v43 }
  0xe2   :  { %v4270_v21 = vpop.f32.mrf.mxu0 }
  0xe3   :  { %v194_v22 = vadd.f32 %v4270_v21, %v4268_v20  ;;  %v208_v36 = vmul.f32 %v4270_v21, %v4270_v21 }
  0xe4   :  { %v4274_v23 = vpop.f32.mrf.mxu0 }
  0xe5   :  { %195 = vadd.xlane.f32.xlu1 %v194_v22  ;;  %v209_v34 = vmul.f32 %v4274_v23, %v4274_v23  ;;  %v219_v40 = vadd.f32 %v208_v36, %v207_v37 }
  0xe6   :  { %v4276_v24 = vpop.f32.mrf.mxu0 }
  0xe7   :  { %v197_v31 = vadd.f32 %v4276_v24, %v4274_v23  ;;  %v210_v33 = vmul.f32 %v4276_v24, %v4276_v24 }
  0xe8   :  { %v4280_v26 = vpop.f32.mrf.mxu0 }
  0xe9   :  { %192 = vadd.xlane.f32.xlu1 %v191_v25  ;;  %v222_v35 = vadd.f32 %v210_v33, %v209_v34  ;;  %v211_v38 = vmul.f32 %v4280_v26, %v4280_v26 }
  0xea   :  { %v4282_v27 = vpop.f32.mrf.mxu0 }
  0xeb   :  { %v200_v28 = vadd.f32 %v4282_v27, %v4280_v26  ;;  %v212_v39 = vmul.f32 %v4282_v27, %v4282_v27 }
  0xec   :  { %v185_v29 = vpop.f32.mrf.mxu0 }
  0xed   :  { %201 = vadd.xlane.f32.xlu0 %v200_v28  ;;  %v225_v41 = vadd.f32 %v212_v39, %v211_v38 }
  0xee   :  { %v186_v30 = vpop.f32.mrf.mxu0 }
  0xf1   :  { %198 = vadd.xlane.f32.xlu0 %v197_v31 }
  0xf5   :  { %189 = vadd.xlane.f32.xlu0 %v188_v32 }
  0xf9   :  { %223 = vadd.xlane.f32.xlu0 %v222_v35 }
  0xfd   :  { %220 = vadd.xlane.f32.xlu0 %v219_v40 }
 0x101   :  { %226 = vadd.xlane.f32.xlu0 %v225_v41 }
 0x105   :  { %217 = vadd.xlane.f32.xlu0 %v216_v44 }
 0x109   :  { %214 = vadd.xlane.f32.xlu0 %v213_v47 }
 0x11c   :  { %233 = vxpose.xlu1.b32.start [1/5] (short) (narrow) %v4313_v48, 16 }
 0x120   :  { %234 = vxpose.xlu1.b32.cont [2/5] (short) (narrow) %v4319_v49, 16 }
 0x124   :  { %235 = vxpose.xlu1.b32.cont [3/5] (short) (narrow) %v4325_v50, 16 }
 0x128   :  { %236 = vxpose.xlu1.b32.cont [4/5] (short) (narrow) %v4331_v51, 16 }
 0x12c   :  { %237 = vxpose.xlu1.b32.end [5/5] (short) (narrow) %v4337_v52, 16 }
 0x14a   :  { %4102 = vset.pattern.permute.xlu1 %v4156_v1 }
 0x16e   :  { %v196_v53 = vpop.xlane.xlu1 %195 }
 0x16f   :  { %v4343_v57 = vand.u32 4294901760, %v196_v53 }
 0x171   :  { %v4356_v63 = vsub.f32 %v196_v53, %v4343_v57 }
 0x172   :  { %v193_v56 = vpop.xlane.xlu1 %192 }
 0x173   :  { %v4350_v60 = vand.u32 4294901760, %v193_v56  ;;  %v4377_v7 = vand.u32 4294901760, %v4356_v63 }
 0x175   :  { %v4365_v3 = vsub.f32 %v193_v56, %v4350_v60  ;;  %v402_v46 = vsub.f32 %v4356_v63, %v4377_v7 }
 0x176   :  { %v202_v54 = vpop.xlane.xlu0 %201 }
 0x177   :  { %v4341_v55 = vand.u32 4294901760, %v202_v54  ;;  %v4385_v10 = vand.u32 4294901760, %v4365_v3  ;;  %v403_v56 = vand.u32 4294901760, %v402_v46 }
 0x179   :  { %v4346_v58 = vsub.f32 %v202_v54, %v4341_v55  ;;  %3721 = vmatprep.subr.mxu1 %v4341_v55  ;;  %v409_v54 = vsub.f32 %v4365_v3, %v4385_v10 }
 0x17a   :  { %v199_v59 = vpop.xlane.xlu0 %198  ;;  %3722 = vmatpush3.msra.mxu1 %v4341_v55 }
 0x17b   :  { %v4352_v61 = vand.u32 4294901760, %v199_v59  ;;  %v387_v62 = vand.u32 4294901760, %v4346_v58 }
 0x17d   :  { %v4359_v0 = vsub.f32 %v199_v59, %v4352_v61  ;;  %3723 = vmatprep.subr.mxu1 %v4352_v61  ;;  %3773 = vmatprep.subr.mxu0 %v387_v62  ;;  %v388_v1 = vsub.f32 %v4346_v58, %v387_v62 }
 0x17e   :  { %3724 = vmatpush3.msra.mxu1 %v4352_v61  ;;  %v190_v2 = vpop.xlane.xlu0 %189  ;;  %3774 = vmatpush3.msra.mxu0 %v387_v62 }
 0x17f   :  { %v4367_v4 = vand.u32 4294901760, %v190_v2  ;;  %3725 = vmatprep.subr.mxu1 %v4343_v57  ;;  %v394_v5 = vand.u32 4294901760, %v4359_v0  ;;  %v389_v8 = vand.u32 4294901760, %v388_v1  ;;  %v410_v1 = vand.u32 4294901760, %v409_v54 }
 0x180   :  { %3726 = vmatpush3.msra.mxu1 %v4343_v57 }
 0x181   :  { %v4373_v6 = vsub.f32 %v190_v2, %v4367_v4  ;;  %3727 = vmatprep.subr.mxu1 %v4350_v60  ;;  %3775 = vmatprep.subr.mxu0 %v394_v5  ;;  %v395_v43 = vsub.f32 %v4359_v0, %v394_v5 }
 0x182   :  { %3728 = vmatpush3.msra.mxu1 %v4350_v60  ;;  %3776 = vmatpush3.msra.mxu0 %v394_v5  ;;  %v4380_v9 = vpop.xlane.xlu0 %223 }
 0x183   :  { %3729 = vmatprep.subr.mxu1 %v4367_v4  ;;  %3777 = vmatprep.subr.mxu0 %v4377_v7  ;;  %v4391_v11 = vand.u32 4294901760, %v4373_v6  ;;  %v4413_v34 = vand.u32 4294901760, %v4380_v9  ;;  %v396_v47 = vand.u32 4294901760, %v395_v43 }
 0x184   :  { %3730 = vmatpush3.msra.mxu1 %v4367_v4  ;;  %3778 = vmatpush3.msra.mxu0 %v4377_v7 }
 0x185   :  { %3779 = vmatprep.subr.mxu0 %v4385_v10  ;;  %3734 = vmatprep.subr.mxu1 %v389_v8  ;;  %v416_v59 = vsub.f32 %v4373_v6, %v4391_v11  ;;  %v4455_v62 = vsub.f32 %v4380_v9, %v4413_v34 }
 0x186   :  { %3780 = vmatpush3.msra.mxu0 %v4385_v10  ;;  %v221_v12 = vpop.xlane.xlu0 %220 }
 0x187   :  { %3781 = vmatprep.subr.mxu0 %v4391_v11  ;;  %v4422_v37 = vand.u32 4294901760, %v221_v12  ;;  %v417_v5 = vand.u32 4294901760, %v416_v59  ;;  %v937_v10 = vand.u32 4294901760, %v4455_v62 }
 0x188   :  { %3782 = vmatpush3.msra.mxu0 %v4391_v11 }
 0x189   :  { %v4460_v2 = vsub.f32 %v221_v12, %v4422_v37 }
 0x18a   :  { %v227_v13 = vpop.xlane.xlu0 %226 }
 0x18b   :  { %v4396_v14 = vand.u32 4294901760, %v227_v13 }
 0x18d   :  { %3799 = vmatprep.subr.mxu0 %v4396_v14  ;;  %v4444_v53 = vsub.f32 %v227_v13, %v4396_v14 }
 0x18e   :  { %v218_v30 = vpop.xlane.xlu0 %217 }
 0x18f   :  { %v4429_v41 = vand.u32 4294901760, %v218_v30  ;;  %v930_v9 = vand.u32 4294901760, %v4444_v53 }
 0x191   :  { %v4465_v7 = vsub.f32 %v218_v30, %v4429_v41 }
 0x192   :  { %v215_v40 = vpop.xlane.xlu0 %214 }
 0x193   :  { %v4436_v44 = vand.u32 4294901760, %v215_v40 }
 0x198   :  { %v249_v15 = vpop.trf.xlu1 }
 0x199   :  { %v267_v22 = vsel %vm265_vm2, %v249_v15, 0 }
 0x19a   :  { %v4400_v25 = vand.u32 4294901760, %v267_v22 }
 0x19c   :  { %v4403_v28 = vsub.f32 %v267_v22, %v4400_v25  ;;  %3783 = vmatprep.mubr.f32.mxu0 %v4400_v25  ;;  %v250_v29 = vpop.trf.xlu1 }
 0x19d   :  { %v270_v31 = vsel %vm265_vm2, %v250_v29, 0 }
 0x19e   :  { %v4407_v32 = vand.u32 4294901760, %v270_v31  ;;  %v4410_v33 = vand.u32 4294901760, %v4403_v28 }
 0x1a0   :  { %v4416_v35 = vsub.f32 %v270_v31, %v4407_v32  ;;  %3784 = vmatmul.mubr.f32.vlgmr.msra.gmra.mxu0 %v4407_v32  ;;  %v345_v36 = vsub.f32 %v4403_v28, %v4410_v33 }
 0x1a1   :  { %3800 = vmatpush3.msra.mxu0 %v4396_v14 }
 0x1a2   :  { %3801 = vmatprep.subr.mxu0 %v4413_v34  ;;  %v346_v38 = vand.u32 4294901760, %v345_v36  ;;  %v4426_v39 = vand.u32 4294901760, %v4416_v35 }
 0x1a3   :  { %3802 = vmatpush3.msra.mxu0 %v4413_v34 }
 0x1a4   :  { %3803 = vmatprep.subr.mxu0 %v4422_v37  ;;  %3731 = vmatprep.mubr.f32.mxu1 %v346_v38  ;;  %v355_v42 = vsub.f32 %v4416_v35, %v4426_v39 }
 0x1a5   :  { %3804 = vmatpush3.msra.mxu0 %v4422_v37  ;;  %3809 = vmatprep.mubr.f32.mxu0 %v346_v38 }
 0x1a6   :  { %3805 = vmatprep.subr.mxu0 %v4429_v41  ;;  %v356_v45 = vand.u32 4294901760, %v355_v42 }
 0x1a7   :  { %3806 = vmatpush3.msra.mxu0 %v4429_v41 }
 0x1a8   :  { %3807 = vmatprep.subr.mxu0 %v4436_v44  ;;  %3732 = vmatmul.mubr.f32.vlgmr.msra.gmra.mxu1 %v356_v45 }
 0x1a9   :  { %3735 = vmatpush3.msra.mxu1 %v389_v8  ;;  %3808 = vmatpush3.msra.mxu0 %v4436_v44  ;;  %v4470_v8 = vsub.f32 %v215_v40, %v4436_v44 }
 0x1aa   :  { %3736 = vmatprep.subr.mxu1 %v396_v47  ;;  %3744 = vmatprep.mubr.f32.mxu1 %v4400_v25 }
 0x1ab   :  { %3810 = vmatmul.mubr.f32.vlgmr.msra.gmra.mxu0 %v356_v45  ;;  %3825 = vmatprep.subr.mxu0 %v4444_v53  ;;  %v958_v11 = vand.u32 4294901760, %v4470_v8 }
 0x1ac   :  { %3737 = vmatpush3.msra.mxu1 %v396_v47  ;;  %3826 = vmatpush3.msra.mxu0 %v4444_v53 }
 0x1ad   :  { %3835 = vmatprep.mubr.f32.mxu0 %v4403_v28  ;;  %3738 = vmatprep.subr.mxu1 %v403_v56 }
 0x1ae   :  { %3827 = vmatprep.subr.mxu0 %v4455_v62  ;;  %3739 = vmatpush3.msra.mxu1 %v403_v56 }
 0x1af   :  { %3828 = vmatpush3.msra.mxu0 %v4455_v62  ;;  %3740 = vmatprep.subr.mxu1 %v410_v1 }
 0x1b0   :  { %3829 = vmatprep.subr.mxu0 %v4460_v2  ;;  %3741 = vmatpush3.msra.mxu1 %v410_v1 }
 0x1b1   :  { %3830 = vmatpush3.msra.mxu0 %v4460_v2  ;;  %3742 = vmatprep.subr.mxu1 %v417_v5 }
 0x1b2   :  { %3831 = vmatprep.subr.mxu0 %v4465_v7  ;;  %3743 = vmatpush3.msra.mxu1 %v417_v5 }
 0x1b3   :  { %3832 = vmatpush3.msra.mxu0 %v4465_v7  ;;  %3745 = vmatmul.mubr.f32.vlgmr.msra.gmra.mxu1 %v4407_v32 }
 0x1b4   :  { %3747 = vmatprep.subr.mxu1 %v4346_v58  ;;  %3833 = vmatprep.subr.mxu0 %v4470_v8 }
 0x1b5   :  { %3748 = vmatpush3.msra.mxu1 %v4346_v58  ;;  %3757 = vmatprep.mubr.f32.mxu1 %v4403_v28  ;;  %v944_v58 = vand.u32 4294901760, %v4460_v2 }
 0x1b6   :  { %3834 = vmatpush3.msra.mxu0 %v4470_v8  ;;  %3749 = vmatprep.subr.mxu1 %v4359_v0 }
 0x1b7   :  { %3836 = vmatmul.mubr.f32.vlgmr.msra.gmra.mxu0 %v4416_v35  ;;  %3851 = vmatprep.subr.mxu0 %v930_v9 }
 0x1b8   :  { %3750 = vmatpush3.msra.mxu1 %v4359_v0  ;;  %3852 = vmatpush3.msra.mxu0 %v930_v9  ;;  %v951_v0 = vand.u32 4294901760, %v4465_v7 }
 0x1b9   :  { %3861 = vmatprep.mubr.f32.mxu0 %v4400_v25  ;;  %3751 = vmatprep.subr.mxu1 %v4356_v63 }
 0x1ba   :  { %3853 = vmatprep.subr.mxu0 %v937_v10  ;;  %3752 = vmatpush3.msra.mxu1 %v4356_v63  ;;  %v931_v63 = vsub.f32 %v4444_v53, %v930_v9  ;;  %v952_v12 = vsub.f32 %v4465_v7, %v951_v0 }
 0x1bb   :  { %3854 = vmatpush3.msra.mxu0 %v937_v10  ;;  %3753 = vmatprep.subr.mxu1 %v4365_v3 }
 0x1bc   :  { %3855 = vmatprep.subr.mxu0 %v944_v58  ;;  %3754 = vmatpush3.msra.mxu1 %v4365_v3  ;;  %v938_v3 = vsub.f32 %v4455_v62, %v937_v10  ;;  %v953_v13 = vand.u32 4294901760, %v952_v12 }
 0x1bd   :  { %3856 = vmatpush3.msra.mxu0 %v944_v58  ;;  %3755 = vmatprep.subr.mxu1 %v4373_v6 }
 0x1be   :  { %3857 = vmatprep.subr.mxu0 %v951_v0  ;;  %3756 = vmatpush3.msra.mxu1 %v4373_v6  ;;  %v945_v6 = vsub.f32 %v4460_v2, %v944_v58 }
 0x1bf   :  { %3858 = vmatpush3.msra.mxu0 %v951_v0  ;;  %3758 = vmatmul.mubr.f32.vlgmr.msra.gmra.mxu1 %v4416_v35 }
 0x1c0   :  { %3760 = vmatprep.subr.mxu1 %v4341_v55  ;;  %3859 = vmatprep.subr.mxu0 %v958_v11 }
 0x1c1   :  { %3761 = vmatpush3.msra.mxu1 %v4341_v55  ;;  %3770 = vmatprep.mubr.f32.mxu1 %v4410_v33 }
 0x1c2   :  { %3860 = vmatpush3.msra.mxu0 %v958_v11  ;;  %3762 = vmatprep.subr.mxu1 %v4352_v61 }
 0x1c3   :  { %3862 = vmatmul.mubr.f32.vlgmr.msra.gmra.mxu0 %v4407_v32  ;;  %3763 = vmatpush3.msra.mxu1 %v4352_v61 }
 0x1c4   :  { %3764 = vmatprep.subr.mxu1 %v4343_v57 }
 0x1c5   :  { %3765 = vmatpush3.msra.mxu1 %v4343_v57 }
 0x1c6   :  { %3766 = vmatprep.subr.mxu1 %v4350_v60 }
 0x1c7   :  { %3767 = vmatpush3.msra.mxu1 %v4350_v60 }
 0x1c8   :  { %3768 = vmatprep.subr.mxu1 %v4367_v4 }
 0x1c9   :  { %3769 = vmatpush3.msra.mxu1 %v4367_v4 }
 0x1ca   :  { %3771 = vmatmul.mubr.f32.vlgmr.msra.gmra.mxu1 %v4426_v39  ;;  %3786 = vmatprep.subr.mxu1 %v4341_v55 }
 0x1cb   :  { %3787 = vmatpush3.msra.mxu1 %v4341_v55  ;;  %3796 = vmatprep.mubr.f32.mxu1 %v4400_v25  ;;  %v932_v55 = vand.u32 4294901760, %v931_v63 }
 0x1cc   :  { %3788 = vmatprep.subr.mxu1 %v4352_v61 }
 0x1cd   :  { %3789 = vmatpush3.msra.mxu1 %v4352_v61  ;;  %v939_v61 = vand.u32 4294901760, %v938_v3 }
 0x1ce   :  { %3790 = vmatprep.subr.mxu1 %v4343_v57 }
 0x1cf   :  { %3791 = vmatpush3.msra.mxu1 %v4343_v57  ;;  %v946_v57 = vand.u32 4294901760, %v945_v6 }
 0x1d0   :  { %3792 = vmatprep.subr.mxu1 %v4350_v60 }
 0x1d1   :  { %3793 = vmatpush3.msra.mxu1 %v4350_v60  ;;  %v959_v60 = vsub.f32 %v4470_v8, %v958_v11 }
 0x1d2   :  { %3794 = vmatprep.subr.mxu1 %v4367_v4 }
 0x1d3   :  { %3795 = vmatpush3.msra.mxu1 %v4367_v4  ;;  %v960_v15 = vand.u32 4294901760, %v959_v60  ;;  %v4157_v4 = vmov 0.0  }
 0x1d4   :  { %3797 = vmatmul.mubr.f32.vlgmr.msra.gmra.mxu1 %v4407_v32  ;;  %3812 = vmatprep.subr.mxu1 %v932_v55 }
 0x1d5   :  { %3813 = vmatpush3.msra.mxu1 %v932_v55  ;;  %3822 = vmatprep.mubr.f32.mxu1 %v4400_v25 }
 0x1d6   :  { %3814 = vmatprep.subr.mxu1 %v939_v61  ;;  %3877 = vmatprep.subr.mxu0 %v4157_v4 }
 0x1d7   :  { %3815 = vmatpush3.msra.mxu1 %v939_v61  ;;  %3881 = vmatprep.mubr.msk.f32.mxu0 %vm4158_vm3, %v4157_v4 }
 0x1d8   :  { %3816 = vmatprep.subr.mxu1 %v946_v57 }
 0x1d9   :  { %3817 = vmatpush3.msra.mxu1 %v946_v57  ;;  %v4570_v57 = vld [vmem:[%s4930_s9 + $0x8] sm:$0x3] }
 0x1da   :  { %3818 = vmatprep.subr.mxu1 %v953_v13 }
 0x1db   :  { %3819 = vmatpush3.msra.mxu1 %v953_v13  ;;  %v4575_v13 = vld [vmem:[%s4930_s9] sm:$0xff] }
 0x1dc   :  { %3820 = vmatprep.subr.mxu1 %v960_v15 }
 0x1dd   :  { %3821 = vmatpush3.msra.mxu1 %v960_v15 }
 0x1de   :  { %3823 = vmatmul.mubr.f32.vlgmr.msra.gmra.mxu1 %v4407_v32  ;;  %3838 = vmatprep.subr.mxu1 %v4396_v14 }
 0x1df   :  { %3839 = vmatpush3.msra.mxu1 %v4396_v14  ;;  %3848 = vmatprep.mubr.f32.mxu1 %v4410_v33 }
 0x1e0   :  { %3840 = vmatprep.subr.mxu1 %v4413_v34 }
 0x1e1   :  { %3841 = vmatpush3.msra.mxu1 %v4413_v34 }
 0x1e2   :  { %3842 = vmatprep.subr.mxu1 %v4422_v37 }
 0x1e3   :  { %3843 = vmatpush3.msra.mxu1 %v4422_v37 }
 0x1e4   :  { %3844 = vmatprep.subr.mxu1 %v4429_v41 }
 0x1e5   :  { %3845 = vmatpush3.msra.mxu1 %v4429_v41 }
 0x1e6   :  { %3846 = vmatprep.subr.mxu1 %v4436_v44 }
 0x1e7   :  { %3847 = vmatpush3.msra.mxu1 %v4436_v44 }
 0x1e8   :  { %3849 = vmatmul.mubr.f32.vlgmr.msra.gmra.mxu1 %v4426_v39  ;;  %3864 = vmatprep.subr.mxu1 %v4396_v14 }
 0x1e9   :  { %3865 = vmatpush3.msra.mxu1 %v4396_v14  ;;  %3874 = vmatprep.mubr.f32.mxu1 %v4400_v25 }
 0x1ea   :  { %3866 = vmatprep.subr.mxu1 %v4413_v34 }
 0x1eb   :  { %3867 = vmatpush3.msra.mxu1 %v4413_v34 }
 0x1ec   :  { %3868 = vmatprep.subr.mxu1 %v4422_v37 }
 0x1ed   :  { %3869 = vmatpush3.msra.mxu1 %v4422_v37 }
 0x1ee   :  { %3870 = vmatprep.subr.mxu1 %v4429_v41 }
 0x1ef   :  { %3871 = vmatpush3.msra.mxu1 %v4429_v41 }
 0x1f0   :  { %3872 = vmatprep.subr.mxu1 %v4436_v44 }
 0x1f1   :  { %3873 = vmatpush3.msra.mxu1 %v4436_v44 }
 0x1f2   :  { %3875 = vmatmul.mubr.f32.vlgmr.msra.gmra.mxu1 %v4407_v32  ;;  %1572 = vmatprep.subr.mxu1 %v4282_v27 }
 0x1f3   :  { %1573 = vmatpush1.msra.mxu1 %v4280_v26  ;;  %1614 = vmatprep.mubr.f32.mxu1 %v4157_v4 }
 0x1f4   :  { %1574 = vmatprep.subr.mxu1 %v4276_v24 }
 0x1f5   :  { %1575 = vmatpush1.msra.mxu1 %v4274_v23 }
 0x1f6   :  { %1576 = vmatprep.subr.mxu1 %v4270_v21 }
 0x1f7   :  { %1577 = vmatpush1.msra.mxu1 %v4268_v20 }
 0x1f8   :  { %1578 = vmatprep.subr.mxu1 %v4266_v19 }
 0x1f9   :  { %1579 = vmatpush1.msra.mxu1 %v4264_v18 }
 0x1fa   :  { %1580 = vmatprep.subr.mxu1 %v4262_v17 }
 0x1fb   :  { %1581 = vmatpush1.msra.mxu1 %v4260_v16 }
 0x1fc   :  { %3896 = vmatprep.subr.mxu1 %v4157_v4 }
 0x260   :  { %v3785_v16 = vpop.f32.mrf.mxu0 }
 0x262   :  { %v721_v14 = vpop.f32.mrf.mxu0 }
 0x268   :  { %v3733_v20 = vpop.f32.mrf.mxu1 }
 0x26a   :  { %v348_v21 = vpop.f32.mrf.mxu1 }
 0x26b   :  { %v3811_v25 = vpop.f32.mrf.mxu0 }
 0x26d   :  { %v891_v32 = vpop.f32.mrf.mxu0 }
 0x273   :  { %v3746_v19 = vpop.f32.mrf.mxu1 }
 0x274   :  { %v461_v29 = vadd.f32 %v3746_v19, %v3733_v20 }
 0x275   :  { %v454_v23 = vpop.f32.mrf.mxu1 }
 0x276   :  { %v455_v30 = vadd.f32 %v454_v23, %v348_v21 }
 0x277   :  { %v3837_v37 = vpop.f32.mrf.mxu0 }
 0x279   :  { %v1085_v43 = vpop.f32.mrf.mxu0 }
 0x27f   :  { %v3759_v18 = vpop.f32.mrf.mxu1 }
 0x280   :  { %v550_v31 = vadd.f32 %v3759_v18, %v461_v29 }
 0x281   :  { %v542_v24 = vpop.f32.mrf.mxu1 }
 0x282   :  { %v543_v34 = vadd.f32 %v542_v24, %v455_v30 }
 0x283   :  { %v3863_v54 = vpop.f32.mrf.mxu0 }
 0x285   :  { %v1264_v2 = vpop.f32.mrf.mxu0 }
 0x28a   :  { %v3772_v17 = vpop.f32.mrf.mxu1 }
 0x28b   :  { %v636_v35 = vadd.f32 %v3772_v17, %v550_v31  ;;  %v1480_v31 = vld [vmem:[%s4931_s3 + $0x18] sm:$0xff] }
 0x28c   :  { %v627_v26 = vpop.f32.mrf.mxu1 }
 0x28d   :  { %v628_v39 = vadd.f32 %v627_v26, %v543_v34  ;;  %v728_v41 = vadd.f32 %v3785_v16, %v636_v35  ;;  %v1477_v16 = vld [vmem:[%s4931_s3] sm:$0xff] }
 0x28e   :  { %v1481_v34 = vld [vmem:[%s4931_s3 + $0x20] sm:$0xff] }
 0x28f   :  { %v722_v46 = vadd.f32 %v721_v14, %v628_v39  ;;  %v1478_v14 = vld [vmem:[%s4931_s3 + $0x8] sm:$0xff] }
 0x294   :  { %v3798_v27 = vpop.f32.mrf.mxu1 }
 0x295   :  { %v810_v45 = vadd.f32 %v3798_v27, %v728_v41 }
 0x296   :  { %v803_v22 = vpop.f32.mrf.mxu1 }
 0x297   :  { %v804_v56 = vadd.f32 %v803_v22, %v722_v46  ;;  %v814_v62 = vmul.f32 0.0013888889, %v810_v45 }
 0x299   :  { %v813_v7 = vmul.f32 0.0013888889, %v804_v56  ;;  %v1359_v58 = vmul.f32 %v814_v62, %v814_v62 }
 0x29b   :  { %v1358_v63 = vmul.f32 %v813_v7, %v813_v7 }
 0x29e   :  { %v3824_v28 = vpop.f32.mrf.mxu1 }
 0x29f   :  { %v1004_v36 = vadd.f32 %v3824_v28, %v3811_v25  ;;  %v1479_v28 = vld [vmem:[%s4931_s3 + $0x10] sm:$0xff]  ;;  %s4161_s3 = smov 1  }
 0x2a0   :  { %v997_v33 = vpop.f32.mrf.mxu1 }
 0x2a1   :  { %v998_v40 = vadd.f32 %v997_v33, %v891_v32  ;;  %v1093_v42 = vadd.f32 %v3837_v37, %v1004_v36 }
 0x2a3   :  { %v1086_v53 = vadd.f32 %v1085_v43, %v998_v40 }
 0x2a8   :  { %v3850_v38 = vpop.f32.mrf.mxu1 }
 0x2a9   :  { %v1179_v47 = vadd.f32 %v3850_v38, %v1093_v42 }
 0x2aa   :  { %v1170_v44 = vpop.f32.mrf.mxu1 }
 0x2ab   :  { %v1171_v59 = vadd.f32 %v1170_v44, %v1086_v53  ;;  %v1271_v1 = vadd.f32 %v3863_v54, %v1179_v47 }
 0x2ad   :  { %v1265_v9 = vadd.f32 %v1264_v2, %v1171_v59 }
 0x2b2   :  { %v3876_v5 = vpop.f32.mrf.mxu1 }
 0x2b3   :  { %v1353_v8 = vadd.f32 %v3876_v5, %v1271_v1  ;;  %v4159_v5 = vmov 1  }
 0x2b4   :  { %v1346_v10 = vpop.f32.mrf.mxu1 }
 0x2b5   :  { %v1357_v0 = vmul.f32 0.0013888889, %v1353_v8  ;;  %v1347_v11 = vadd.f32 %v1346_v10, %v1265_v9 }
 0x2b7   :  { %v1361_v3 = vsub.f32 %v1357_v0, %v1359_v58  ;;  %v1356_v55 = vmul.f32 0.0013888889, %v1347_v11 }
 0x2b9   :  { %v1363_v6 = vmax.f32 %v1361_v3, 0.0  ;;  %v1360_v61 = vsub.f32 %v1356_v55, %v1358_v63 }
 0x2bb   :  { %4142 = vrsqrt.f32 %v1363_v6  ;;  %v1362_v12 = vmax.f32 %v1360_v61, 0.0 }
 0x2bd   :  { %4144 = vrsqrt.f32 %v1362_v12 }
 0x2c8   :  { %v4143_v60 = vpop.eup %4142 }
 0x2c9   :  { %v1367_v15 = vmul.f32 %v4143_v60, %v4570_v57 }
 0x2ca   :  { %v4145_v20 = vpop.eup %4144 }
 0x2cb   :  { %3878 = vmatpush3.msk.msra.mxu0 %vm120_vm0, %v1367_v15  ;;  %v1366_v21 = vmul.f32 %v4145_v20, %v4575_v13  ;;  %v4160_v15 = vmov 2  }
 0x2cc   :  { %3879 = vmatprep.subr.mxu0 %v4157_v4 }
 0x2cd   :  { %3880 = vmatpush3.msra.mxu0 %v1366_v21 }
 0x2ce   :  { %3882 = vmatmul.mubr.msk.f32.vlgmr.msra.gmra.mxu0 %vm1368_vm4, %v4313_v48 }
 0x2cf   :  { %3884 = vmatprep.mubr.msk.f32.mxu0 %vm4158_vm3, %v4157_v4 }
 0x2d2   :  { %3885 = vmatmul.mubr.msk.f32.gmra.mxu0 %vm1368_vm4, %v4319_v49 }
 0x2d3   :  { %3887 = vmatprep.mubr.msk.f32.mxu0 %vm4158_vm3, %v4157_v4 }
 0x2d6   :  { %3888 = vmatmul.mubr.msk.f32.gmra.mxu0 %vm1368_vm4, %v4325_v50 }
 0x2d7   :  { %3890 = vmatprep.mubr.msk.f32.mxu0 %vm4158_vm3, %v4157_v4 }
 0x2da   :  { %3891 = vmatmul.mubr.msk.f32.gmra.mxu0 %vm1368_vm4, %v4331_v51 }
 0x2db   :  { %3893 = vmatprep.mubr.msk.f32.mxu0 %vm4158_vm3, %v4157_v4 }
 0x2de   :  { %3894 = vmatmul.mubr.msk.f32.gmra.mxu0 %vm1368_vm4, %v4337_v52 }
 0x38e   :  { %v1453_v48 = vpop.f32.mrf.mxu0 }
 0x38f   :  { %1484 = vperm.xlu0 %4101, %v1453_v48  }
 0x390   :  { %v3883_v49 = vpop.f32.mrf.mxu0 }
 0x392   :  { %v1458_v19 = vpop.f32.mrf.mxu0 }
 0x393   :  { %1489 = vperm.xlu1 %4102, %v1458_v19  }
 0x394   :  { %v3886_v23 = vpop.f32.mrf.mxu0 }
 0x396   :  { %v1463_v18 = vpop.f32.mrf.mxu0 }
 0x397   :  { %1494 = vperm.xlu0 %4101, %v1463_v18   ;;  %4103 = vset.pattern.permute.xlu1 %v4159_v5  ;;  %v4126_v18 = vld [vmem:[%s4932_s4 + $0x78] sm:$0xff]  }
 0x398   :  { %v3889_v50 = vpop.f32.mrf.mxu0  ;;  %3621 = vmatprep.subr.bf16.mxu0 %v4126_v18 }
 0x399   :  { %v4127_v50 = vld [vmem:[%s4932_s4 + $0x38] sm:$0xff]  }
 0x39a   :  { %v1468_v24 = vpop.f32.mrf.mxu0  ;;  %3622 = vmatpush3.bf16.msra.mxu0 %v4127_v50 }
 0x39b   :  { %1499 = vperm.xlu0 %4101, %v1468_v24   ;;  %v4128_v24 = vld [vmem:[%s4932_s4 + $0x70] sm:$0xff]  }
 0x39c   :  { %v3892_v17 = vpop.f32.mrf.mxu0  ;;  %3623 = vmatprep.subr.bf16.mxu0 %v4128_v24 }
 0x39d   :  { %v4129_v17 = vld [vmem:[%s4932_s4 + $0x30] sm:$0xff]  }
 0x39e   :  { %v1473_v26 = vpop.f32.mrf.mxu0  ;;  %3624 = vmatpush3.bf16.msra.mxu0 %v4129_v17 }
 0x39f   :  { %1504 = vperm.xlu0 %4101, %v1473_v26   ;;  %v4130_v26 = vld [vmem:[%s4932_s4 + $0x68] sm:$0xff]  }
 0x3a0   :  { %v3895_v51 = vpop.f32.mrf.mxu0  ;;  %3625 = vmatprep.subr.bf16.mxu0 %v4130_v26 }
 0x3a1   :  { %v4131_v51 = vld [vmem:[%s4932_s4 + $0x28] sm:$0xff]  }
 0x3a2   :  { %3626 = vmatpush3.bf16.msra.mxu0 %v4131_v51 }
 0x40a   :  { %v1485_v52 = vpop.permute.xlu0 %1484 }
 0x40b   :  { %v1507_v27 = vmul.f32 %v1485_v52, %v1477_v16  ;;  %v4132_v16 = vld [vmem:[%s4932_s4 + $0x60] sm:$0xff]  }
 0x40c   :  { %v4133_v52 = vld [vmem:[%s4932_s4 + $0x20] sm:$0xff]   ;;  %3627 = vmatprep.subr.bf16.mxu0 %v4132_v16 }
 0x40d   :  { %1512 = vxpose.xlu0.b32.start [1/5] (short) (narrow) %v1507_v27, 16  ;;  %v4134_v27 = vld [vmem:[%s4932_s4 + $0x58] sm:$0xff]   ;;  %3628 = vmatpush3.bf16.msra.mxu0 %v4133_v52 }
 0x40e   :  { %v1490_v22 = vpop.permute.xlu1 %1489  ;;  %3629 = vmatprep.subr.bf16.mxu0 %v4134_v27 }
 0x40f   :  { %v1508_v25 = vmul.f32 %v1490_v22, %v1478_v14  ;;  %v4135_v14 = vld [vmem:[%s4932_s4 + $0x18] sm:$0xff]   ;;  %v4136_v22 = vld [vmem:[%s4932_s4 + $0x50] sm:$0xff]  }
 0x411   :  { %1513 = vxpose.xlu0.b32.cont [2/5] (short) (narrow) %v1508_v25, 16  ;;  %3630 = vmatpush3.bf16.msra.mxu0 %v4135_v14  ;;  %v4137_v25 = vld [vmem:[%s4932_s4 + $0x10] sm:$0xff]  }
 0x412   :  { %v1495_v29 = vpop.permute.xlu0 %1494  ;;  %3631 = vmatprep.subr.bf16.mxu0 %v4136_v22 }
 0x413   :  { %v1509_v30 = vmul.f32 %v1495_v29, %v1479_v28  ;;  %v4138_v28 = vld [vmem:[%s4932_s4 + $0x48] sm:$0xff]  }
 0x414   :  { %v4139_v29 = vld [vmem:[%s4932_s4 + $0x8] sm:$0xff]  }
 0x415   :  { %1514 = vxpose.xlu0.b32.cont [3/5] (short) (narrow) %v1509_v30, 16  ;;  %3632 = vmatpush3.bf16.msra.mxu0 %v4137_v25  ;;  %v4140_v30 = vld [vmem:[%s4932_s4 + $0x40] sm:$0xff]  }
 0x416   :  { %v1500_v32 = vpop.permute.xlu0 %1499  ;;  %3633 = vmatprep.subr.bf16.mxu0 %v4138_v28  ;;  %v2442_v28 = vld [vmem:[%s4934_s7] sm:$0xf] }
 0x417   :  { %v1510_v33 = vmul.f32 %v1500_v32, %v1480_v31  ;;  %v4141_v32 = vld [vmem:[%s4932_s4] sm:$0xff]  }
 0x419   :  { %1515 = vxpose.xlu0.b32.cont [4/5] (short) (narrow) %v1510_v33, 16  ;;  %3634 = vmatpush3.bf16.msra.mxu0 %v4139_v29  ;;  %v2455_v29 = vsel %vm2453_vm5, %v2442_v28, 0 }
 0x41a   :  { %v1505_v35 = vpop.permute.xlu0 %1504  ;;  %3635 = vmatprep.subr.bf16.mxu0 %v4140_v30  ;;  %v4820_v30 = vand.u32 4294901760, %v2455_v29 }
 0x41b   :  { %v1511_v36 = vmul.f32 %v1505_v35, %v1481_v34 }
 0x41d   :  { %1516 = vxpose.xlu0.b32.end [5/5] (short) (narrow) %v1511_v36, 16  ;;  %3636 = vmatpush3.bf16.msra.mxu0 %v4141_v32 }
 0x41e   :  { %3922 = vmatprep.subr.mxu0 %v4157_v4 }
 0x446   :  { %4106 = vset.pattern.permute.xlu0 %v4160_v15 }
 0x489   :  { %v1528_v37 = vpop.trf.xlu0 }
 0x48a   :  { %3512 = vmatmul.mubr.msk.f32.vlgmr.msra.gmra.mxu1 %vm265_vm2, %v1528_v37 }
 0x48b   :  { %1620 = vmatprep.mubr.f32.mxu1 %v4157_v4 }
 0x48d   :  { %v1529_v38 = vpop.trf.xlu0 }
 0x48e   :  { %3513 = vmatmul.mubr.msk.f32.gmra.mxu1 %vm265_vm2, %v1529_v38 }
 0x48f   :  { %3900 = vmatprep.mubr.msk.f32.mxu1 %vm4158_vm3, %v4157_v4 }
 0x54a   :  { %v4619_v39 = vpop.f32.mrf.mxu1 }
 0x54b   :  { %v1637_v42 = vmul.f32 %v4619_v39, %v4619_v39 }
 0x54c   :  { %v4621_v40 = vpop.f32.mrf.mxu1 }
 0x54d   :  { %v1627_v41 = vadd.f32 %v4621_v40, %v4619_v39  ;;  %v1638_v43 = vmul.f32 %v4621_v40, %v4621_v40 }
 0x54e   :  { %v4629_v44 = vpop.f32.mrf.mxu1 }
 0x54f   :  { %1628 = vadd.xlane.f32.xlu1 %v1627_v41  ;;  %v1641_v45 = vadd.f32 %v1638_v43, %v1637_v42  ;;  %v1639_v47 = vmul.f32 %v4629_v44, %v4629_v44  ;;  %v1630_v54 = vsel %vm120_vm0, %v4629_v44, 0.0 }
 0x550   :  { %v4631_v46 = vpop.f32.mrf.mxu1 }
 0x551   :  { %v1640_v53 = vmul.f32 %v4631_v46, %v4631_v46  ;;  %1642 = vadd.xlane.f32.xlu0 %v1641_v45  ;;  %v1631_v56 = vsel %vm120_vm0, %v4631_v46, 0.0  ;;  %v1644_v1 = vsel %vm120_vm0, %v1639_v47, 0.0 }
 0x552   :  { %v1632_v59 = vadd.f32 %v1631_v56, %v1630_v54 }
 0x553   :  { %v1645_v62 = vsel %vm120_vm0, %v1640_v53, 0.0 }
 0x554   :  { %1633 = vadd.xlane.f32.xlu1 %v1632_v59  ;;  %v1646_v2 = vadd.f32 %v1645_v62, %v1644_v1 }
 0x558   :  { %1647 = vadd.xlane.f32.xlu1 %v1646_v2 }
 0x5d8   :  { %v1629_v7 = vpop.xlane.xlu1 %1628 }
 0x5d9   :  { %v1635_v8 = vmul.f32 0.0055555557, %v1629_v7 }
 0x5da   :  { %v1643_v9 = vpop.xlane.xlu0 %1642 }
 0x5db   :  { %v1651_v10 = vmul.f32 %v1635_v8, %v1635_v8  ;;  %v1649_v58 = vmul.f32 0.0055555557, %v1643_v9 }
 0x5dd   :  { %v1653_v0 = vsub.f32 %v1649_v58, %v1651_v10  ;;  %v1634_v11 = vpop.xlane.xlu1 %1633 }
 0x5de   :  { %v1636_v63 = vmul.f32 0.0055555557, %v1634_v11 }
 0x5df   :  { %v1655_v3 = vmax.f32 %v1653_v0, 0.0 }
 0x5e0   :  { %v1652_v6 = vmul.f32 %v1636_v63, %v1636_v63 }
 0x5e1   :  { %4146 = vrsqrt.f32 %v1655_v3  ;;  %v1648_v55 = vpop.xlane.xlu1 %1647 }
 0x5e2   :  { %v1650_v61 = vmul.f32 0.0055555557, %v1648_v55 }
 0x5e4   :  { %v1654_v12 = vsub.f32 %v1650_v61, %v1652_v6 }
 0x5e6   :  { %v1656_v60 = vmax.f32 %v1654_v12, 0.0 }
 0x5e8   :  { %4148 = vrsqrt.f32 %v1656_v60 }
 0x5ee   :  { %v4147_v20 = vpop.eup %4146 }
 0x5ef   :  { %v1659_v21 = vmul.f32 %v4147_v20, %v4575_v13 }
 0x5f1   :  { %v1661_v48 = vmul.f32 %v1659_v21, %v1635_v8  ;;  %v1878_v8 = vld [vmem:[%s4933_s5 + $0x10] sm:$0xf] }
 0x5f2   :  { %v1886_v11 = vsel %vm1368_vm4, %v1878_v8, 0 }
 0x5f3   :  { %1665 = vrot.lane.b32.xlu1 %v1661_v48, %s4161_s3  ;;  %v4727_v55 = vand.u32 4294901760, %v1886_v11 }
 0x5f5   :  { %v4149_v49 = vpop.eup %4148 }
 0x5f6   :  { %v1660_v19 = vmul.f32 %v4149_v49, %v4570_v57 }
 0x5f8   :  { %v1662_v23 = vmul.f32 %v1660_v19, %v1636_v63 }
 0x5fa   :  { %1667 = vrot.lane.b32.xlu1 %v1662_v23, %s4161_s3 }
 0x5fe   :  { %1675 = vperm.xlu1 %4103, %v1659_v21   ;;  %v4736_v21 = vsub.f32 %v1886_v11, %v4727_v55 }
 0x600   :  { %v1980_v50 = vand.u32 4294901760, %v4736_v21 }
 0x602   :  { %4104 = vset.pattern.permute.xlu1 %v4160_v15  ;;  %v1981_v16 = vsub.f32 %v4736_v21, %v1980_v50 }
 0x604   :  { %v1982_v22 = vand.u32 4294901760, %v1981_v16 }
 0x665   :  { %v1666_v31 = vpop.permute.xlu1 %1665 }
 0x666   :  { %v1671_v33 = vsub.f32 %v4575_v13, %v1666_v31  ;;  %v4823_v31 = vsub.f32 %v2455_v29, %v4820_v30  ;;  %v2438_v29 = vld [vmem:[%s4935_s6 + $0x10] sm:$0xf] }
 0x668   :  { %1689 = vperm.xlu1 %4104, %v1671_v33   ;;  %v2586_v32 = vand.u32 4294901760, %v4823_v31 }
 0x66a   :  { %v2587_v33 = vsub.f32 %v4823_v31, %v2586_v32 }
 0x66c   :  { %4105 = vset.pattern.permute.xlu1 %v4159_v5  ;;  %v1668_v34 = vpop.permute.xlu1 %1667 }
 0x66d   :  { %v1672_v35 = vsub.f32 %v4570_v57, %v1668_v34  ;;  %1680 = vperm.xlu1 %4105, %v1660_v19   ;;  %v2588_v34 = vand.u32 4294901760, %v2587_v33 }
 0x66f   :  { %1694 = vperm.xlu0 %4106, %v1672_v35  }
 0x679   :  { %v1676_v36 = vpop.permute.xlu1 %1675 }
 0x67a   :  { %v1683_v37 = vmul.f32 %v1676_v36, %v4619_v39  ;;  %v1684_v38 = vmul.f32 %v1676_v36, %v4621_v40  ;;  %v1876_v39 = vld [vmem:[%s4933_s5] sm:$0xff] }
 0x67b   :  { %v1880_v40 = vsel %vm1368_vm4, %v1876_v39, 0 }
 0x6e3   :  { %v1690_v41 = vpop.permute.xlu1 %1689 }
 0x6e4   :  { %v1697_v42 = vadd.f32 %v1690_v41, %v1683_v37  ;;  %v1698_v43 = vadd.f32 %v1690_v41, %v1684_v38 }
 0x6e6   :  { %v1701_v45 = vmul.f32 %v1697_v42, %v1697_v42  ;;  %v1702_v47 = vmul.f32 %v1698_v43, %v1698_v43 }
 0x6e8   :  { %1865 = vmatprep.mubr.f32.mxu0 %v1702_v47  ;;  %v1681_v53 = vpop.permute.xlu1 %1680 }
 0x6e9   :  { %v1685_v54 = vmul.f32 %v1681_v53, %v4629_v44  ;;  %v1686_v56 = vmul.f32 %v1681_v53, %v4631_v46  ;;  %1866 = vmatmul.mubr.f32.vlgmr.msra.gmra.mxu0 %v1701_v45  ;;  %v1877_v44 = vld [vmem:[%s4933_s5 + $0x8] sm:$0xff]  ;;  %v4711_v46 = vand.u32 4294901760, %v1880_v40 }
 0x6ea   :  { %v1695_v57 = vpop.permute.xlu0 %1694  ;;  %v1883_v5 = vsel %vm1368_vm4, %v1877_v44, 0 }
 0x6eb   :  { %v1699_v59 = vadd.f32 %v1695_v57, %v1685_v54  ;;  %v1700_v62 = vadd.f32 %v1695_v57, %v1686_v56  ;;  %v4718_v10 = vsub.f32 %v1880_v40, %v4711_v46  ;;  %v4720_v58 = vand.u32 4294901760, %v1883_v5 }
 0x6ed   :  { %v1703_v1 = vmul.f32 %v1699_v59, %v1699_v59  ;;  %v1704_v2 = vmul.f32 %v1700_v62, %v1700_v62  ;;  %v1960_v63 = vand.u32 4294901760, %v4718_v10  ;;  %v4725_v3 = vsub.f32 %v1883_v5, %v4720_v58 }
 0x6ef   :  { %1870 = vmatprep.mubr.f32.mxu0 %v1704_v2  ;;  %v1961_v15 = vsub.f32 %v4718_v10, %v1960_v63  ;;  %v1970_v20 = vand.u32 4294901760, %v4725_v3 }
 0x6f0   :  { %1871 = vmatmul.mubr.f32.gmra.mxu0 %v1703_v1 }
 0x6f1   :  { %3926 = vmatprep.mubr.msk.f32.mxu0 %vm4158_vm3, %v4157_v4  ;;  %v1962_v23 = vand.u32 4294901760, %v1961_v15  ;;  %v1971_v18 = vsub.f32 %v4725_v3, %v1970_v20 }
 0x6f3   :  { %v1972_v51 = vand.u32 4294901760, %v1971_v18 }
 0x7a9   :  { %v3637_v7 = vpop.f32.mrf.mxu0 }
 0x7ab   :  { %v3638_v9 = vpop.f32.mrf.mxu0 }
 0x7ac   :  { %v3639_v0 = vadd.f32 %v3638_v9, %v3637_v7 }
 0x7ae   :  { %v4729_v6 = vand.u32 4294901760, %v3639_v0 }
 0x7b0   :  { %v3640_v61 = vpop.f32.mrf.mxu0  ;;  %v2025_v48 = vsub.f32 %v3639_v0, %v4729_v6 }
 0x7b2   :  { %v3641_v12 = vpop.f32.mrf.mxu0  ;;  %v2026_v24 = vand.u32 4294901760, %v2025_v48 }
 0x7b3   :  { %v3642_v60 = vadd.f32 %v3641_v12, %v3640_v61 }
 0x7b4   :  { %v2027_v52 = vsub.f32 %v2025_v48, %v2026_v24 }
 0x7b5   :  { %v1889_v49 = vsel %vm120_vm0, %v3642_v60, 0 }
 0x7b6   :  { %v1920_v19 = vand.u32 4294901760, %v1889_v49  ;;  %v2028_v25 = vand.u32 4294901760, %v2027_v52 }
 0x7b8   :  { %v2018_v17 = vsub.f32 %v1889_v49, %v1920_v19  ;;  %3897 = vmatpush3.msra.mxu1 %v1920_v19 }
 0x7b9   :  { %3898 = vmatprep.subr.mxu1 %v4157_v4 }
 0x7ba   :  { %3899 = vmatpush3.msra.mxu1 %v4729_v6  ;;  %3923 = vmatpush3.msra.mxu0 %v2018_v17  ;;  %v2019_v26 = vand.u32 4294901760, %v2018_v17 }
 0x7bb   :  { %3901 = vmatmul.mubr.f32.vlgmr.msra.gmra.mxu1 %v1962_v23  ;;  %3924 = vmatprep.subr.mxu0 %v4157_v4 }
 0x7bc   :  { %3925 = vmatpush3.msra.mxu0 %v2025_v48  ;;  %3903 = vmatprep.mubr.msk.f32.mxu1 %vm4158_vm3, %v4157_v4  ;;  %v2020_v27 = vsub.f32 %v2018_v17, %v2019_v26  ;;  %v2436_v48 = vld [vmem:[%s4935_s6] sm:$0xff] }
 0x7bd   :  { %3948 = vmatprep.subr.mxu0 %v4157_v4  ;;  %3927 = vmatmul.mubr.f32.vlgmr.msra.gmra.mxu0 %v4718_v10 }
 0x7be   :  { %3949 = vmatpush3.msra.mxu0 %v2019_v26  ;;  %3909 = vmatprep.subr.mxu1 %v4157_v4  ;;  %v2021_v14 = vand.u32 4294901760, %v2020_v27  ;;  %v2437_v26 = vld [vmem:[%s4935_s6 + $0x8] sm:$0xff] }
 0x7bf   :  { %3904 = vmatmul.mubr.f32.gmra.mxu1 %v1972_v51  ;;  %3950 = vmatprep.subr.mxu0 %v4157_v4 }
 0x7c0   :  { %3910 = vmatpush3.msra.mxu1 %v2021_v14  ;;  %3951 = vmatpush3.msra.mxu0 %v2026_v24 }
 0x7c1   :  { %3911 = vmatprep.subr.mxu1 %v4157_v4  ;;  %3906 = vmatprep.mubr.msk.f32.mxu1 %vm4158_vm3, %v4157_v4 }
 0x7c2   :  { %3912 = vmatpush3.msra.mxu1 %v2028_v25  ;;  %3929 = vmatprep.mubr.msk.f32.mxu0 %vm4158_vm3, %v4157_v4 }
 0x7c3   :  { %3907 = vmatmul.mubr.f32.gmra.mxu1 %v1982_v22  ;;  %3935 = vmatprep.subr.mxu1 %v4157_v4 }
 0x7c4   :  { %3913 = vmatprep.mubr.msk.f32.mxu1 %vm4158_vm3, %v4157_v4  ;;  %3930 = vmatmul.mubr.f32.gmra.mxu0 %v4725_v3 }
 0x7c5   :  { %3932 = vmatprep.mubr.msk.f32.mxu0 %vm4158_vm3, %v4157_v4  ;;  %3974 = vmatprep.subr.mxu0 %v4157_v4 }
 0x7c7   :  { %3914 = vmatmul.mubr.f32.vlgmr.msra.gmra.mxu1 %v4711_v46 }
 0x7c8   :  { %3936 = vmatpush3.msra.mxu1 %v1920_v19  ;;  %3916 = vmatprep.mubr.msk.f32.mxu1 %vm4158_vm3, %v4157_v4 }
 0x7c9   :  { %3937 = vmatprep.subr.mxu1 %v4157_v4  ;;  %3933 = vmatmul.mubr.f32.gmra.mxu0 %v4736_v21 }
 0x7ca   :  { %3938 = vmatpush3.msra.mxu1 %v4729_v6  ;;  %3952 = vmatprep.mubr.msk.f32.mxu0 %vm4158_vm3, %v4157_v4 }
 0x7cb   :  { %3917 = vmatmul.mubr.f32.gmra.mxu1 %v4720_v58  ;;  %3961 = vmatprep.subr.mxu1 %v4157_v4 }
 0x7cc   :  { %3919 = vmatprep.mubr.msk.f32.mxu1 %vm4158_vm3, %v4157_v4 }
 0x7cd   :  { %3953 = vmatmul.mubr.f32.vlgmr.msra.gmra.mxu0 %v4711_v46 }
 0x7ce   :  { %3955 = vmatprep.mubr.msk.f32.mxu0 %vm4158_vm3, %v4157_v4  ;;  %3975 = vmatpush3.msra.mxu0 %v4820_v30 }
 0x7cf   :  { %3920 = vmatmul.mubr.f32.gmra.mxu1 %v4727_v55  ;;  %3996 = vmatprep.subr.mxu0 %v4157_v4 }
 0x7d0   :  { %3939 = vmatprep.mubr.msk.f32.mxu1 %vm4158_vm3, %v4157_v4 }
 0x7d1   :  { %3956 = vmatmul.mubr.f32.gmra.mxu0 %v4720_v58 }
 0x7d2   :  { %3958 = vmatprep.mubr.msk.f32.mxu0 %vm4158_vm3, %v4157_v4 }
 0x7d3   :  { %3940 = vmatmul.mubr.f32.vlgmr.msra.gmra.mxu1 %v1960_v63 }
 0x7d4   :  { %3962 = vmatpush3.msra.mxu1 %v1920_v19  ;;  %3942 = vmatprep.mubr.msk.f32.mxu1 %vm4158_vm3, %v4157_v4 }
 0x7d5   :  { %3963 = vmatprep.subr.mxu1 %v4157_v4  ;;  %3959 = vmatmul.mubr.f32.gmra.mxu0 %v4727_v55 }
 0x7d6   :  { %3964 = vmatpush3.msra.mxu1 %v4729_v6  ;;  %3976 = vmatprep.mubr.msk.f32.mxu0 %vm4158_vm3, %v4157_v4 }
 0x7d7   :  { %3943 = vmatmul.mubr.f32.gmra.mxu1 %v1970_v20  ;;  %3985 = vmatprep.subr.mxu1 %v4157_v4 }
 0x7d8   :  { %3945 = vmatprep.mubr.msk.f32.mxu1 %vm4158_vm3, %v4157_v4 }
 0x7db   :  { %3946 = vmatmul.mubr.f32.gmra.mxu1 %v1980_v50 }
 0x7dc   :  { %3965 = vmatprep.mubr.msk.f32.mxu1 %vm4158_vm3, %v4157_v4 }
 0x7df   :  { %3966 = vmatmul.mubr.f32.vlgmr.msra.gmra.mxu1 %v4711_v46 }
 0x7e0   :  { %3968 = vmatprep.mubr.msk.f32.mxu1 %vm4158_vm3, %v4157_v4  ;;  %3986 = vmatpush3.msra.mxu1 %v2588_v34 }
 0x7e1   :  { %4007 = vmatprep.subr.mxu1 %v4157_v4 }
 0x7e3   :  { %3969 = vmatmul.mubr.f32.gmra.mxu1 %v4720_v58 }
 0x7e4   :  { %3971 = vmatprep.mubr.msk.f32.mxu1 %vm4158_vm3, %v4157_v4 }
 0x7e7   :  { %3972 = vmatmul.mubr.f32.gmra.mxu1 %v4727_v55 }
 0x7e8   :  { %3987 = vmatprep.mubr.msk.f32.mxu1 %vm4158_vm3, %v4157_v4 }
 0x87b   :  { %v1964_v35 = vpop.f32.mrf.mxu1 }
 0x87d   :  { %v3902_v36 = vpop.f32.mrf.mxu1  ;;  %v2153_v37 = vpop.f32.mrf.mxu0 }
 0x87f   :  { %v1974_v38 = vpop.f32.mrf.mxu1  ;;  %v3928_v41 = vpop.f32.mrf.mxu0 }
 0x881   :  { %v3905_v42 = vpop.f32.mrf.mxu1 }
 0x883   :  { %v1984_v43 = vpop.f32.mrf.mxu1 }
 0x884   :  { %v2160_v45 = vpop.f32.mrf.mxu0 }
 0x885   :  { %v3908_v47 = vpop.f32.mrf.mxu1 }
 0x886   :  { %v3931_v53 = vpop.f32.mrf.mxu0 }
 0x887   :  { %v2065_v54 = vpop.f32.mrf.mxu1 }
 0x888   :  { %v2066_v8 = vadd.f32 %v2065_v54, %v1964_v35 }
 0x889   :  { %v3915_v56 = vpop.f32.mrf.mxu1  ;;  %v2167_v57 = vpop.f32.mrf.mxu0 }
 0x88a   :  { %v2154_v11 = vadd.f32 %v2153_v37, %v2066_v8 }
 0x88b   :  { %v2071_v59 = vpop.f32.mrf.mxu1  ;;  %v3934_v62 = vpop.f32.mrf.mxu0 }
 0x88c   :  { %v2072_v63 = vadd.f32 %v2071_v59, %v1974_v38 }
 0x88d   :  { %v3918_v1 = vpop.f32.mrf.mxu1  ;;  %v2335_v2 = vpop.f32.mrf.mxu0 }
 0x88e   :  { %v2161_v61 = vadd.f32 %v2160_v45, %v2072_v63 }
 0x88f   :  { %v2077_v39 = vpop.f32.mrf.mxu1  ;;  %v3954_v40 = vpop.f32.mrf.mxu0 }
 0x890   :  { %v2078_v12 = vadd.f32 %v2077_v39, %v1984_v43 }
 0x891   :  { %v3921_v44 = vpop.f32.mrf.mxu1  ;;  %v2341_v46 = vpop.f32.mrf.mxu0 }
 0x892   :  { %v2168_v49 = vadd.f32 %v2167_v57, %v2078_v12 }
 0x893   :  { %v2242_v5 = vpop.f32.mrf.mxu1  ;;  %v3957_v7 = vpop.f32.mrf.mxu0 }
 0x894   :  { %v2243_v55 = vadd.f32 %v2242_v5, %v2154_v11 }
 0x895   :  { %v3941_v9 = vpop.f32.mrf.mxu1  ;;  %v2347_v10 = vpop.f32.mrf.mxu0 }
 0x896   :  { %v2336_v15 = vadd.f32 %v2335_v2, %v2243_v55 }
 0x897   :  { %v2250_v58 = vpop.f32.mrf.mxu1  ;;  %v3960_v0 = vpop.f32.mrf.mxu0 }
 0x898   :  { %v2251_v20 = vadd.f32 %v2250_v58, %v2161_v61 }
 0x899   :  { %v3944_v3 = vpop.f32.mrf.mxu1 }
 0x89a   :  { %v2342_v18 = vadd.f32 %v2341_v46, %v2251_v20 }
 0x89b   :  { %v2258_v6 = vpop.f32.mrf.mxu1 }
 0x89c   :  { %v2259_v50 = vadd.f32 %v2258_v6, %v2168_v49 }
 0x89d   :  { %v3947_v60 = vpop.f32.mrf.mxu1 }
 0x89e   :  { %v2348_v14 = vadd.f32 %v2347_v10, %v2259_v50 }
 0x89f   :  { %v2420_v21 = vpop.f32.mrf.mxu1 }
 0x8a0   :  { %v2421_v19 = vadd.f32 %v2420_v21, %v2336_v15 }
 0x8a1   :  { %v3967_v23 = vpop.f32.mrf.mxu1 }
 0x8a2   :  { %v2439_v24 = vmul.f32 %v2436_v48, %v2421_v19 }
 0x8a3   :  { %v2426_v17 = vpop.f32.mrf.mxu1 }
 0x8a4   :  { %v2445_v51 = vsel %vm2443_vm6, %v2439_v24, 0  ;;  %v2427_v16 = vadd.f32 %v2426_v17, %v2342_v18 }
 0x8a5   :  { %v2523_v52 = vand.u32 4294901760, %v2445_v51  ;;  %v3970_v27 = vpop.f32.mrf.mxu1 }
 0x8a6   :  { %v2440_v22 = vmul.f32 %v2437_v26, %v2427_v16 }
 0x8a7   :  { %v2524_v25 = vsub.f32 %v2445_v51, %v2523_v52  ;;  %v2432_v28 = vpop.f32.mrf.mxu1  ;;  %3988 = vmatmul.mubr.f32.vlgmr.msra.gmra.mxu1 %v2523_v52 }
 0x8a8   :  { %v2448_v33 = vsel %vm2443_vm6, %v2440_v22, 0  ;;  %v2433_v34 = vadd.f32 %v2432_v28, %v2348_v14  ;;  %3990 = vmatprep.mubr.msk.f32.mxu1 %vm4158_vm3, %v4157_v4  ;;  %4008 = vmatpush3.msra.mxu1 %v4820_v30 }
 0x8a9   :  { %v2525_v35 = vand.u32 4294901760, %v2524_v25  ;;  %v2533_v36 = vand.u32 4294901760, %v2448_v33  ;;  %v3973_v37 = vpop.f32.mrf.mxu1  ;;  %4029 = vmatprep.subr.mxu1 %v4157_v4 }
 0x8aa   :  { %v2441_v38 = vmul.f32 %v2438_v29, %v2433_v34 }
 0x8ab   :  { %v2526_v41 = vsub.f32 %v2524_v25, %v2525_v35  ;;  %v2534_v42 = vsub.f32 %v2448_v33, %v2533_v36  ;;  %3991 = vmatmul.mubr.f32.gmra.mxu1 %v2533_v36 }
 0x8ac   :  { %v2451_v43 = vsel %vm2443_vm6, %v2441_v38, 0  ;;  %3993 = vmatprep.mubr.msk.f32.mxu1 %vm4158_vm3, %v4157_v4 }
 0x8ad   :  { %v2527_v45 = vand.u32 4294901760, %v2526_v41  ;;  %v2543_v47 = vand.u32 4294901760, %v2451_v43  ;;  %v2535_v53 = vand.u32 4294901760, %v2534_v42 }
 0x8af   :  { %v2544_v54 = vsub.f32 %v2451_v43, %v2543_v47  ;;  %3977 = vmatmul.mubr.f32.vlgmr.msra.gmra.mxu0 %v2527_v45  ;;  %3994 = vmatmul.mubr.f32.gmra.mxu1 %v2543_v47  ;;  %v2536_v56 = vsub.f32 %v2534_v42, %v2535_v53 }
 0x8b0   :  { %3979 = vmatprep.mubr.msk.f32.mxu0 %vm4158_vm3, %v4157_v4  ;;  %4009 = vmatprep.mubr.msk.f32.mxu1 %vm4158_vm3, %v4157_v4 }
 0x8b1   :  { %v2537_v57 = vand.u32 4294901760, %v2536_v56  ;;  %3997 = vmatpush3.msra.mxu0 %v4823_v31  ;;  %v2545_v59 = vand.u32 4294901760, %v2544_v54 }
 0x8b2   :  { %4018 = vmatprep.subr.mxu0 %v4157_v4 }
 0x8b3   :  { %3980 = vmatmul.mubr.f32.gmra.mxu0 %v2537_v57  ;;  %4010 = vmatmul.mubr.f32.vlgmr.msra.gmra.mxu1 %v2525_v35  ;;  %v2546_v62 = vsub.f32 %v2544_v54, %v2545_v59 }
 0x8b4   :  { %3982 = vmatprep.mubr.msk.f32.mxu0 %vm4158_vm3, %v4157_v4  ;;  %4012 = vmatprep.mubr.msk.f32.mxu1 %vm4158_vm3, %v4157_v4 }
 0x8b5   :  { %v2547_v1 = vand.u32 4294901760, %v2546_v62  ;;  %4030 = vmatpush3.msra.mxu1 %v4820_v30  ;;  %v4162_v30 = vmov 3  }
 0x8b6   :  { %4049 = vmatprep.subr.mxu1 %v4157_v4  ;;  %4107 = vset.pattern.permute.xlu1 %v4162_v30 }
 0x8b7   :  { %3983 = vmatmul.mubr.f32.gmra.mxu0 %v2547_v1  ;;  %4013 = vmatmul.mubr.f32.gmra.mxu1 %v2535_v53 }
 0x8b8   :  { %3998 = vmatprep.mubr.msk.f32.mxu0 %vm4158_vm3, %v4157_v4  ;;  %4015 = vmatprep.mubr.msk.f32.mxu1 %vm4158_vm3, %v4157_v4 }
 0x8b9   :  { %4108 = vset.pattern.permute.xlu0 %v4162_v30  ;;  %3001 = vperm.xlu1 %4107, %v4575_v13  }
 0x8bb   :  { %3999 = vmatmul.mubr.f32.vlgmr.msra.gmra.mxu0 %v2524_v25  ;;  %4016 = vmatmul.mubr.f32.gmra.mxu1 %v2545_v59 }
 0x8bc   :  { %4001 = vmatprep.mubr.msk.f32.mxu0 %vm4158_vm3, %v4157_v4  ;;  %4031 = vmatprep.mubr.msk.f32.mxu1 %vm4158_vm3, %v4157_v4 }
 0x8bd   :  { %4019 = vmatpush3.msra.mxu0 %v2586_v32 }
 0x8be   :  { %4040 = vmatprep.subr.mxu0 %v4157_v4 }
 0x8bf   :  { %4002 = vmatmul.mubr.f32.gmra.mxu0 %v2534_v42  ;;  %4032 = vmatmul.mubr.f32.vlgmr.msra.gmra.mxu1 %v2523_v52 }
 0x8c0   :  { %4004 = vmatprep.mubr.msk.f32.mxu0 %vm4158_vm3, %v4157_v4  ;;  %4034 = vmatprep.mubr.msk.f32.mxu1 %vm4158_vm3, %v4157_v4 }
 0x8c3   :  { %4005 = vmatmul.mubr.f32.gmra.mxu0 %v2544_v54  ;;  %4035 = vmatmul.mubr.f32.gmra.mxu1 %v2533_v36 }
 0x8c4   :  { %4020 = vmatprep.mubr.msk.f32.mxu0 %vm4158_vm3, %v4157_v4  ;;  %4037 = vmatprep.mubr.msk.f32.mxu1 %vm4158_vm3, %v4157_v4 }
 0x8c7   :  { %4021 = vmatmul.mubr.f32.vlgmr.msra.gmra.mxu0 %v2523_v52  ;;  %4038 = vmatmul.mubr.f32.gmra.mxu1 %v2543_v47 }
 0x8c8   :  { %4023 = vmatprep.mubr.msk.f32.mxu0 %vm4158_vm3, %v4157_v4  ;;  %4055 = vmatprep.mubr.msk.f32.mxu1 %vm4158_vm3, %v4157_v4 }
 0x8cb   :  { %4024 = vmatmul.mubr.f32.gmra.mxu0 %v2533_v36 }
 0x8cc   :  { %4026 = vmatprep.mubr.msk.f32.mxu0 %vm4158_vm3, %v4157_v4 }
 0x8cf   :  { %4027 = vmatmul.mubr.f32.gmra.mxu0 %v2543_v47  ;;  %v2998_v47 = vld [vmem:[%s4936_s8] sm:$0xf] }
 0x8d0   :  { %4046 = vmatprep.mubr.msk.f32.mxu0 %vm4158_vm3, %v4157_v4  ;;  %v3006_v53 = vsel %vm3004_vm7, %v2998_v47, 0 }
 0x8d1   :  { %v4893_v54 = vand.u32 4294901760, %v3006_v53 }
 0x8d3   :  { %v3080_v57 = vsub.f32 %v3006_v53, %v4893_v54 }
 0x967   :  { %v2625_v31 = vpop.f32.mrf.mxu1 }
 0x969   :  { %v3989_v32 = vpop.f32.mrf.mxu1 }
 0x96b   :  { %v2631_v2 = vpop.f32.mrf.mxu1 }
 0x96d   :  { %v3992_v39 = vpop.f32.mrf.mxu1 }
 0x96f   :  { %v2529_v40 = vpop.f32.mrf.mxu0  ;;  %v2637_v44 = vpop.f32.mrf.mxu1 }
 0x970   :  { %v2626_v60 = vadd.f32 %v2625_v31, %v2529_v40  ;;  %v3081_v31 = vand.u32 4294901760, %v3080_v57 }
 0x971   :  { %v3978_v46 = vpop.f32.mrf.mxu0  ;;  %v3995_v5 = vpop.f32.mrf.mxu1 }
 0x972   :  { %v3082_v46 = vsub.f32 %v3080_v57, %v3081_v31 }
 0x973   :  { %v2539_v7 = vpop.f32.mrf.mxu0  ;;  %v2799_v8 = vpop.f32.mrf.mxu1 }
 0x974   :  { %v2632_v19 = vadd.f32 %v2631_v2, %v2539_v7 }
 0x975   :  { %v3981_v9 = vpop.f32.mrf.mxu0  ;;  %v4011_v10 = vpop.f32.mrf.mxu1 }
 0x976   :  { %v3083_v10 = vand.u32 4294901760, %v3082_v46 }
 0x977   :  { %v2549_v58 = vpop.f32.mrf.mxu0  ;;  %v2807_v0 = vpop.f32.mrf.mxu1 }
 0x978   :  { %v2638_v51 = vadd.f32 %v2637_v44, %v2549_v58 }
 0x979   :  { %v3984_v11 = vpop.f32.mrf.mxu0  ;;  %v4014_v63 = vpop.f32.mrf.mxu1 }
 0x97b   :  { %v2711_v3 = vpop.f32.mrf.mxu0  ;;  %v2815_v55 = vpop.f32.mrf.mxu1 }
 0x97c   :  { %v2712_v21 = vadd.f32 %v2711_v3, %v2626_v60  ;;  %v3002_v60 = vpop.permute.xlu1 %3001 }
 0x97d   :  { %v4000_v6 = vpop.f32.mrf.mxu0  ;;  %v4017_v13 = vpop.f32.mrf.mxu1 }
 0x97e   :  { %v2800_v24 = vadd.f32 %v2799_v8, %v2712_v21 }
 0x97f   :  { %v2718_v61 = vpop.f32.mrf.mxu0  ;;  %v2973_v12 = vpop.f32.mrf.mxu1 }
 0x980   :  { %v2719_v50 = vadd.f32 %v2718_v61, %v2632_v19 }
 0x981   :  { %v4003_v15 = vpop.f32.mrf.mxu0  ;;  %v4033_v20 = vpop.f32.mrf.mxu1 }
 0x982   :  { %v2808_v25 = vadd.f32 %v2807_v0, %v2719_v50 }
 0x983   :  { %v2725_v48 = vpop.f32.mrf.mxu0  ;;  %v2979_v49 = vpop.f32.mrf.mxu1 }
 0x984   :  { %v2726_v14 = vadd.f32 %v2725_v48, %v2638_v51 }
 0x985   :  { %v4006_v23 = vpop.f32.mrf.mxu0  ;;  %v4036_v18 = vpop.f32.mrf.mxu1 }
 0x986   :  { %v2816_v36 = vadd.f32 %v2815_v55, %v2726_v14 }
 0x987   :  { %v2889_v17 = vpop.f32.mrf.mxu0  ;;  %v2985_v26 = vpop.f32.mrf.mxu1 }
 0x988   :  { %v2890_v16 = vadd.f32 %v2889_v17, %v2800_v24 }
 0x989   :  { %v4022_v52 = vpop.f32.mrf.mxu0  ;;  %v4039_v27 = vpop.f32.mrf.mxu1 }
 0x98a   :  { %v2974_v22 = vadd.f32 %v2973_v12, %v2890_v16 }
 0x98b   :  { %v2895_v28 = vpop.f32.mrf.mxu0 }
 0x98c   :  { %v2989_v29 = vmax.f32 %v2974_v22, 1e-10  ;;  %v2896_v33 = vadd.f32 %v2895_v28, %v2808_v25 }
 0x98d   :  { %v4025_v34 = vpop.f32.mrf.mxu0 }
 0x98e   :  { %v2980_v35 = vadd.f32 %v2979_v49, %v2896_v33  ;;  %4150 = vlog2.f32 %v2989_v29 }
 0x98f   :  { %v2901_v37 = vpop.f32.mrf.mxu0 }
 0x990   :  { %v2990_v38 = vmax.f32 %v2980_v35, 1e-10  ;;  %v2902_v41 = vadd.f32 %v2901_v37, %v2816_v36 }
 0x991   :  { %v4028_v42 = vpop.f32.mrf.mxu0 }
 0x992   :  { %4152 = vlog2.f32 %v2990_v38  ;;  %v2986_v43 = vadd.f32 %v2985_v26, %v2902_v41 }
 0x994   :  { %v2991_v45 = vmax.f32 %v2986_v43, 1e-10 }
 0x996   :  { %4154 = vlog2.f32 %v2991_v45 }
 0x99b   :  { %v4151_v56 = vpop.eup %4150 }
 0x99c   :  { %v2993_v62 = vmul.f32 0.6931472, %v4151_v56 }
 0x99e   :  { %v3044_v2 = vand.u32 4294901760, %v2993_v62 }
 0x99f   :  { %v4153_v59 = vpop.eup %4152 }
 0x9a0   :  { %v2995_v1 = vmul.f32 0.6931472, %v4153_v59  ;;  %v3131_v7 = vsub.f32 %v2993_v62, %v3044_v2 }
 0x9a2   :  { %v3041_v30 = vand.u32 4294901760, %v2995_v1  ;;  %v3132_v0 = vand.u32 4294901760, %v3131_v7 }
 0x9a3   :  { %v4155_v32 = vpop.eup %4154 }
 0x9a4   :  { %v2997_v39 = vmul.f32 0.6931472, %v4155_v32  ;;  %v3124_v40 = vsub.f32 %v2995_v1, %v3041_v30  ;;  %v3133_v55 = vsub.f32 %v3131_v7, %v3132_v0 }
 0x9a6   :  { %v3009_v44 = vsel %vm2453_vm5, %v2997_v39, 0  ;;  %v3125_v9 = vand.u32 4294901760, %v3124_v40  ;;  %v3134_v13 = vand.u32 4294901760, %v3133_v55 }
 0x9a7   :  { %v3038_v5 = vand.u32 4294901760, %v3009_v44 }
 0x9a8   :  { %v3126_v63 = vsub.f32 %v3124_v40, %v3125_v9 }
 0x9a9   :  { %4041 = vmatpush3.msra.mxu0 %v3038_v5  ;;  %v3117_v8 = vsub.f32 %v3009_v44, %v3038_v5 }
 0x9aa   :  { %4042 = vmatprep.subr.mxu0 %v4157_v4  ;;  %v3127_v6 = vand.u32 4294901760, %v3126_v63 }
 0x9ab   :  { %4043 = vmatpush3.msra.mxu0 %v3041_v30  ;;  %v3118_v58 = vand.u32 4294901760, %v3117_v8 }
 0x9ac   :  { %4044 = vmatprep.subr.mxu0 %v4157_v4 }
 0x9ad   :  { %4045 = vmatpush3.msra.mxu0 %v3044_v2  ;;  %v3119_v11 = vsub.f32 %v3117_v8, %v3118_v58 }
 0x9ae   :  { %4058 = vmatprep.subr.mxu0 %v4157_v4  ;;  %4047 = vmatmul.mubr.f32.vlgmr.msra.gmra.mxu0 %v3083_v10 }
 0x9af   :  { %4059 = vmatpush3.msra.mxu0 %v3117_v8  ;;  %v3120_v3 = vand.u32 4294901760, %v3119_v11  ;;  %4064 = vmatprep.mubr.msk.f32.mxu0 %vm4158_vm3, %v4157_v4 }
 0x9b0   :  { %4060 = vmatprep.subr.mxu0 %v4157_v4 }
 0x9b1   :  { %4050 = vmatpush3.msra.mxu1 %v3120_v3  ;;  %4061 = vmatpush3.msra.mxu0 %v3124_v40 }
 0x9b2   :  { %4051 = vmatprep.subr.mxu1 %v4157_v4  ;;  %4062 = vmatprep.subr.mxu0 %v4157_v4 }
 0x9b3   :  { %4052 = vmatpush3.msra.mxu1 %v3127_v6  ;;  %4063 = vmatpush3.msra.mxu0 %v3131_v7 }
 0x9b4   :  { %4053 = vmatprep.subr.mxu1 %v4157_v4  ;;  %4076 = vmatprep.subr.mxu0 %v4157_v4 }
 0x9b5   :  { %4054 = vmatpush3.msra.mxu1 %v3134_v13  ;;  %4065 = vmatmul.mubr.f32.vlgmr.msra.gmra.mxu0 %v3080_v57 }
 0x9b6   :  { %4077 = vmatpush3.msra.mxu0 %v3118_v58  ;;  %4067 = vmatprep.subr.mxu1 %v4157_v4 }
 0x9b7   :  { %4078 = vmatprep.subr.mxu0 %v4157_v4  ;;  %4056 = vmatmul.mubr.f32.vlgmr.msra.gmra.mxu1 %v4893_v54 }
 0x9b8   :  { %4068 = vmatpush3.msra.mxu1 %v3038_v5  ;;  %4079 = vmatpush3.msra.mxu0 %v3125_v9 }
 0x9b9   :  { %4069 = vmatprep.subr.mxu1 %v4157_v4  ;;  %4080 = vmatprep.subr.mxu0 %v4157_v4 }
 0x9ba   :  { %4070 = vmatpush3.msra.mxu1 %v3041_v30  ;;  %4081 = vmatpush3.msra.mxu0 %v3132_v0 }
 0x9bb   :  { %4071 = vmatprep.subr.mxu1 %v4157_v4  ;;  %4073 = vmatprep.mubr.msk.f32.mxu1 %vm4158_vm3, %v4157_v4 }
 0x9bc   :  { %4072 = vmatpush3.msra.mxu1 %v3044_v2  ;;  %4082 = vmatprep.mubr.msk.f32.mxu0 %vm4158_vm3, %v4157_v4 }
 0x9bd   :  { %4085 = vmatprep.subr.mxu1 %v4157_v4  ;;  %4074 = vmatmul.mubr.f32.vlgmr.msra.gmra.mxu1 %v3081_v31 }
 0x9be   :  { %4086 = vmatpush3.msra.mxu1 %v3038_v5  ;;  %4083 = vmatmul.mubr.f32.vlgmr.msra.gmra.mxu0 %v4893_v54 }
 0x9bf   :  { %4087 = vmatprep.subr.mxu1 %v4157_v4  ;;  %4091 = vmatprep.mubr.msk.f32.mxu1 %vm4158_vm3, %v4157_v4 }
 0x9c0   :  { %4088 = vmatpush3.msra.mxu1 %v3041_v30 }
 0x9c1   :  { %4089 = vmatprep.subr.mxu1 %v4157_v4 }
 0x9c2   :  { %4090 = vmatpush3.msra.mxu1 %v3044_v2 }
 0x9c3   :  { %4092 = vmatmul.mubr.f32.vlgmr.msra.gmra.mxu1 %v4893_v54 }
 0xa6e   :  { %v3085_v61 = vpop.f32.mrf.mxu0 }
 0xa6f   :  { %v3086_v15 = vadd.f32 %v3085_v61, %v3002_v60 }
 0xa70   :  { %v4048_v12 = vpop.f32.mrf.mxu0 }
 0xa75   :  { %v3249_v20 = vpop.f32.mrf.mxu0 }
 0xa77   :  { %v3171_v21 = vpop.f32.mrf.mxu1  ;;  %v4066_v48 = vpop.f32.mrf.mxu0 }
 0xa78   :  { %v3172_v49 = vadd.f32 %v3171_v21, %v3086_v15 }
 0xa79   :  { %v4057_v19 = vpop.f32.mrf.mxu1 }
 0xa7a   :  { %v3250_v23 = vadd.f32 %v3249_v20, %v3172_v49 }
 0xa7d   :  { %v3325_v18 = vpop.f32.mrf.mxu1 }
 0xa7e   :  { %v3326_v50 = vadd.f32 %v3325_v18, %v3250_v23  ;;  %v3405_v24 = vpop.f32.mrf.mxu0 }
 0xa7f   :  { %v4075_v17 = vpop.f32.mrf.mxu1 }
 0xa80   :  { %v4084_v26 = vpop.f32.mrf.mxu0  ;;  %v3406_v51 = vadd.f32 %v3405_v24, %v3326_v50 }
 0xa83   :  { %v3479_v4 = vpop.f32.mrf.mxu1 }
 0xa84   :  { %v3480_v16 = vadd.f32 %v3479_v4, %v3406_v51 }
 0xa85   :  { %v4093_v52 = vpop.f32.mrf.mxu1 }
 0xa86   :  { %3484 = vst.msk [vmem:[%s4937_s10] sm:$0xf] %vm3483_vm8, %v3480_v16 }

</bundles_post_ra>
